<compile_context>
chip_gen: v6e
topology: v6e:2x2x1
jax: 0.10.0
libtpu: 0.0.40
codegen_flags: <defaults>
</compile_context>

<pallas_src>
import functools

import jax
import jax.numpy as jnp
from jax.experimental import pallas as pl
from jax.experimental.pallas import tpu as pltpu


def _pick_tile(n, target):
    """Largest multiple of 128 that divides n and is <= target, else n (full axis).

    TPU block last-dims must be multiples of 128 or span the full axis.
    """
    t = min(target, n) - (min(target, n) % 128)
    while t >= 128:
        if n % t == 0:
            return t
        t -= 128
    return n


def _flash_self_attention_kernel(
    x_q_ref,      # (1, C, TQ)  input tile providing the queries / residual
    x_kv_ref,     # (1, C, TK)  input tile providing the keys / values
    wq_ref,       # (Cq, C)     folded conv+BN query weight
    bq_ref,       # (Cq, 1)     folded query bias
    wkv_ref,      # (C+Cq, C)   fused [Wv; Wk] weight
    bkv_ref,      # (C+Cq, 1)   fused [bv; bk] bias
    gamma_ref,    # (1,) scalar in SMEM
    o_ref,        # (1, C, TQ)
    q_scr,        # (TQ, Cq)    query tile in MXU-operand dtype
    m_scr,        # (TQ, 1)     running max (f32)
    l_scr,        # (TQ, 1)     running softmax denominator (f32)
    acc_scr,      # (TQ, C)     running numerator (f32)
    *,
    approx_reciprocal,
):
    ki = pl.program_id(2)
    cdt = q_scr.dtype                    # MXU operand dtype (bf16 fast path / f32)
    c = wkv_ref.shape[1]                 # value channels C (wkv rows are [Wv; Wk])

    # ---- once per (batch, q-tile): project the query tile, reset statistics ----
    @pl.when(ki == 0)
    def _init():
        q = jnp.dot(wq_ref[...].astype(cdt), x_q_ref[0].astype(cdt),
                    preferred_element_type=jnp.float32) + bq_ref[...]     # (Cq, TQ)
        q_scr[...] = jnp.transpose(q).astype(cdt)                         # (TQ, Cq)
        m_scr[...] = jnp.full_like(m_scr, -jnp.inf)
        l_scr[...] = jnp.zeros_like(l_scr)
        acc_scr[...] = jnp.zeros_like(acc_scr)

    # ---- fused key/value projection of the current key tile (one matmul) ----
    kv = jnp.dot(wkv_ref[...].astype(cdt), x_kv_ref[0].astype(cdt),
                 preferred_element_type=jnp.float32) + bkv_ref[...]       # (C+Cq, TK)
    kv = kv.astype(cdt)
    v = kv[:c]                    # (C, TK)   slice starts at row 0
    k = kv[c:]                    # (Cq, TK)  slice starts at row C (sublane-aligned)

    # ---- online softmax over key tiles (statistics kept in f32) ----
    s = jnp.dot(q_scr[...], k, preferred_element_type=jnp.float32)        # (TQ, TK)
    m_prev = m_scr[...]
    m_new = jnp.maximum(m_prev, jnp.max(s, axis=-1, keepdims=True))       # (TQ, 1)
    alpha = jnp.exp(m_prev - m_new)
    p = jnp.exp(s - m_new)                                                # (TQ, TK)
    l_scr[...] = alpha * l_scr[...] + jnp.sum(p, axis=-1, keepdims=True)
    acc_scr[...] = alpha * acc_scr[...] + jax.lax.dot_general(
        p.astype(cdt), v,
        dimension_numbers=(((1,), (1,)), ((), ())),
        preferred_element_type=jnp.float32)                               # (TQ, C)
    m_scr[...] = m_new

    # ---- once per (batch, q-tile): deferred normalization + residual write ----
    @pl.when(ki == pl.num_programs(2) - 1)
    def _finalize():
        inv_l = pl.reciprocal(l_scr[...], approx=approx_reciprocal)       # (TQ, 1)
        out = jnp.transpose(acc_scr[...] * inv_l)                         # (C, TQ)
        o_ref[0] = (gamma_ref[0] * out + x_q_ref[0]).astype(o_ref.dtype)


def self_attention_pallas(x_nchw, wq, bq, wk, bk, wv, bv, gamma, *,
                          block_q=256, block_k=512,
                          compute_dtype=jnp.bfloat16,
                          vmem_limit_bytes=48 * 1024 * 1024):
    """SelfAttention forward.  x_nchw: (B, C, H, W) float32.

    wq/wk: (C//8, C), wv: (C, C) folded conv+BN weights; bq/bk: (C//8,),
    bv: (C,) folded biases; gamma: (1,) residual scale.
    """
    B, C, H, W = x_nchw.shape
    N = H * W
    Cq = wq.shape[0]
    compute_dtype = jnp.dtype(compute_dtype)

    # Channels-first (B, C, N): a free reshape, no wrapper transposes needed.
    x = x_nchw.reshape(B, C, N).astype(jnp.float32)

    # Fuse the key/value 1x1 projections into a single matmul.  Order [Wv; Wk]
    # keeps both row slices sublane-aligned (C % 8 == 0, while Cq may not be).
    w_kv = jnp.concatenate([wv, wk], axis=0).astype(jnp.float32)          # (C+Cq, C)
    b_kv = jnp.concatenate([bv, bk], axis=0).reshape(C + Cq, 1).astype(jnp.float32)
    bq_col = bq.reshape(Cq, 1).astype(jnp.float32)
    gamma = jnp.asarray(gamma, jnp.float32).reshape(1)

    tq = _pick_tile(N, block_q)
    tk = _pick_tile(N, block_k)
    nq, nk = N // tq, N // tk

    kernel = functools.partial(
        _flash_self_attention_kernel,
        approx_reciprocal=compute_dtype != jnp.dtype(jnp.float32))

    # Advisory cost hint so XLA schedules surrounding ops sensibly.
    flops = (2 * B * N * N * (Cq + C)           # score + PV matmuls
             + 2 * B * N * Cq * C               # query projection
             + 2 * B * nq * N * (C + Cq) * C)   # fused k/v projection (per q-tile)
    cost = pl.CostEstimate(
        flops=int(flops),
        transcendentals=int(B * N * N),
        bytes_accessed=int(4 * B * N * C * (nq + 2)))

    out = pl.pallas_call(
        kernel,
        out_shape=jax.ShapeDtypeStruct((B, C, N), jnp.float32),
        grid=(B, nq, nk),
        in_specs=[
            pl.BlockSpec((1, C, tq), lambda b, qi, ki: (b, 0, qi)),   # x (query side)
            pl.BlockSpec((1, C, tk), lambda b, qi, ki: (b, 0, ki)),   # x (key/value side)
            pl.BlockSpec((Cq, C), lambda b, qi, ki: (0, 0)),          # Wq
            pl.BlockSpec((Cq, 1), lambda b, qi, ki: (0, 0)),          # bq
            pl.BlockSpec((C + Cq, C), lambda b, qi, ki: (0, 0)),      # [Wv; Wk]
            pl.BlockSpec((C + Cq, 1), lambda b, qi, ki: (0, 0)),      # [bv; bk]
            pl.BlockSpec(memory_space=pltpu.MemorySpace.SMEM),        # gamma scalar
        ],
        out_specs=pl.BlockSpec((1, C, tq), lambda b, qi, ki: (b, 0, qi)),
        scratch_shapes=[
            pltpu.VMEM((tq, Cq), compute_dtype),    # projected query tile
            pltpu.VMEM((tq, 1), jnp.float32),       # running max
            pltpu.VMEM((tq, 1), jnp.float32),       # running denominator
            pltpu.VMEM((tq, C), jnp.float32),       # running numerator
        ],
        compiler_params=pltpu.CompilerParams(
            dimension_semantics=("parallel", "parallel", "arbitrary"),
            vmem_limit_bytes=vmem_limit_bytes),
        cost_estimate=cost,
    )(x, x, wq.astype(jnp.float32), bq_col, w_kv, b_kv, gamma)

    return out.reshape(B, C, H, W)


def _fold_conv_bn(w_conv, bn_weight, bn_bias, bn_mean, bn_var, eps=1e-5):
    """Fold eval-mode BatchNorm into a bias-free 1x1 conv.

    w_conv: (C_out, C_in) -> W_eff (C_out, C_in), b_eff (C_out,).
    """
    scale = bn_weight / jnp.sqrt(bn_var + eps)
    w_eff = w_conv * scale[:, None]
    b_eff = bn_bias - bn_mean * scale
    return w_eff.astype(jnp.float32), b_eff.astype(jnp.float32)


def _reference(x_nchw, wq, bq, wk, bk, wv, bv, gamma, compute_dtype=jnp.float32):
    """Pure-JAX reference of the PyTorch forward (mode='hw').

    compute_dtype=float32 -> exact eval-mode module; bfloat16 -> mirrors the
    kernel's MXU-operand casts (f32 accumulation, f32 softmax statistics).
    """
    B, C, H, W = x_nchw.shape
    N = H * W
    cd = jnp.dtype(compute_dtype)
    hp = jax.lax.Precision.HIGHEST
    xf = x_nchw.reshape(B, C, N)
    xc = xf.astype(cd)

    def proj(w, b):
        y = jnp.einsum("oc,bcn->bon", w.astype(cd), xc,
                       preferred_element_type=jnp.float32, precision=hp)
        return y + b[None, :, None]

    q = proj(wq, bq)                                      # (B, Cq, N)
    k = proj(wk, bk)                                      # (B, Cq, N)
    v = proj(wv, bv)                                      # (B, C,  N)
    s = jnp.einsum("bcn,bcm->bnm", q.astype(cd), k.astype(cd),
                   preferred_element_type=jnp.float32, precision=hp)
    s_max = jnp.max(s, axis=-1, keepdims=True)
    p = jnp.exp(s - s_max)
    l = jnp.sum(p, axis=-1, keepdims=True)                # (B, N, 1)
    num = jnp.einsum("bcm,bnm->bcn", v.astype(cd), p.astype(cd),
                     preferred_element_type=jnp.float32, precision=hp)
    out = num / jnp.swapaxes(l, 1, 2)                     # (B, C, N)
    return gamma[0] * out.reshape(B, C, H, W) + x_nchw


if __name__ == "__main__":
    key = jax.random.PRNGKey(0)
    B, C, H, W = 2, 32, 16, 16        # in_channels=32 -> query/key channels = 4
    Cq = C // 8
    N = H * W

    k_x, k_wq, k_wk, k_wv = jax.random.split(key, 4)
    x = jax.random.normal(k_x, (B, C, H, W), dtype=jnp.float32)

    # Conv 1x1 weights (kaiming-normal: std = sqrt(2 / fan_in)), bias=False.
    std = (2.0 / C) ** 0.5
    wq_conv = jax.random.normal(k_wq, (Cq, C), dtype=jnp.float32) * std
    wk_conv = jax.random.normal(k_wk, (Cq, C), dtype=jnp.float32) * std
    wv_conv = jax.random.normal(k_wv, (C, C), dtype=jnp.float32) * std

    # BatchNorm2d default init (eval mode): weight=1, bias=0, mean=0, var=1.
    def bn_defaults(n):
        return (jnp.ones((n,), jnp.float32), jnp.zeros((n,), jnp.float32),
                jnp.zeros((n,), jnp.float32), jnp.ones((n,), jnp.float32))

    wq, bq = _fold_conv_bn(wq_conv, *bn_defaults(Cq))
    wk, bk = _fold_conv_bn(wk_conv, *bn_defaults(Cq))
    wv, bv = _fold_conv_bn(wv_conv, *bn_defaults(C))

    # Module __init__ sets gamma = 0 (output == x); use a nonzero value so the
    # attention path is actually exercised.
    gamma = jnp.array([0.5], dtype=jnp.float32)

    # Small tiles so the test exercises the multi-tile flash path:
    # N = 256, TQ = TK = 128 -> grid = (2, 2, 2).
    y = self_attention_pallas(x, wq, bq, wk, bk, wv, bv, gamma,
                              block_q=128, block_k=128)
    y = jax.block_until_ready(y)
    assert y.shape == (B, C, H, W)
    assert y.dtype == jnp.float32

    # 1) Tight check against a reference that mirrors the kernel's bf16 MXU
    #    operand casts (f32 accumulation) -- catches any structural bug.
    y_match = _reference(x, wq, bq, wk, bk, wv, bv, gamma,
                         compute_dtype=jnp.bfloat16)
    assert jnp.allclose(y, y_match, atol=2e-2, rtol=2e-2), (
        "mismatch vs bf16-matched reference: "
        f"{float(jnp.max(jnp.abs(y - y_match)))}")

    # 2) Loose sanity check against the exact f32 PyTorch-semantics forward
    #    (bf16 operands perturb the softmax logits slightly).
    y_exact = _reference(x, wq, bq, wk, bk, wv, bv, gamma,
                         compute_dtype=jnp.float32)
    assert float(jnp.max(jnp.abs(y - y_exact))) < 0.25, (
        "drift vs exact reference: "
        f"{float(jnp.max(jnp.abs(y - y_exact)))}")

    print("KERNEL_OK")
</pallas_src>

<mosaic_0001>
module attributes {stable_mosaic.version = 11 : i64} {
  func.func @_flash_self_attention_kernel(%arg0: i32, %arg1: i32, %arg2: i32, %arg3: memref<1x32x128xf32, #tpu.memory_space<vmem>>, %arg4: memref<1x32x128xf32, #tpu.memory_space<vmem>>, %arg5: memref<4x32xf32, #tpu.memory_space<vmem>>, %arg6: memref<4x1xf32, #tpu.memory_space<vmem>>, %arg7: memref<36x32xf32, #tpu.memory_space<vmem>>, %arg8: memref<36x1xf32, #tpu.memory_space<vmem>>, %arg9: memref<1xf32, #tpu.memory_space<smem>>, %arg10: memref<1x32x128xf32, #tpu.memory_space<vmem>>, %arg11: memref<128x4xbf16, #tpu.memory_space<vmem>>, %arg12: memref<128x1xf32, #tpu.memory_space<vmem>>, %arg13: memref<128x1xf32, #tpu.memory_space<vmem>>, %arg14: memref<128x32xf32, #tpu.memory_space<vmem>>) attributes {dimension_semantics = [#tpu.dimension_semantics<parallel>, #tpu.dimension_semantics<parallel>, #tpu.dimension_semantics<arbitrary>], iteration_bounds = array<i64: 2, 2, 2>, scalar_prefetch = 0 : i64, scratch_operands = 4 : i64, tpu.core_type = #tpu.core_type<tc>, window_params = [{transform_indices = @transform_0, window_bounds = array<i64: 1, 32, 128>}, {transform_indices = @transform_1, window_bounds = array<i64: 1, 32, 128>}, {pipeline_mode = #tpu.pipeline_mode<synchronous>, transform_indices = @transform_2, window_bounds = array<i64: 4, 32>}, {pipeline_mode = #tpu.pipeline_mode<synchronous>, transform_indices = @transform_3, window_bounds = array<i64: 4, 1>}, {pipeline_mode = #tpu.pipeline_mode<synchronous>, transform_indices = @transform_4, window_bounds = array<i64: 36, 32>}, {pipeline_mode = #tpu.pipeline_mode<synchronous>, transform_indices = @transform_5, window_bounds = array<i64: 36, 1>}, {transform_indices = @transform_6, window_bounds = array<i64: 1>}, {transform_indices = @transform_7, window_bounds = array<i64: 1, 32, 128>}]} {
    %c0_i32 = arith.constant 0 : i32
    %0 = arith.cmpi eq, %arg2, %c0_i32 : i32
    %1 = arith.extui %0 : i1 to i32
    %c0_i32_0 = arith.constant 0 : i32
    %2 = arith.cmpi ne, %1, %c0_i32_0 : i32
    scf.if %2 {
      %c0_26 = arith.constant 0 : index
      %c0_27 = arith.constant 0 : index
      %43 = vector.load %arg5[%c0_26, %c0_27] : memref<4x32xf32, #tpu.memory_space<vmem>>, vector<4x32xf32>
      %44 = arith.truncf %43 : vector<4x32xf32> to vector<4x32xbf16>
      %c0_28 = arith.constant 0 : index
      %c0_29 = arith.constant 0 : index
      %c0_30 = arith.constant 0 : index
      %45 = vector.load %arg3[%c0_28, %c0_29, %c0_30] : memref<1x32x128xf32, #tpu.memory_space<vmem>>, vector<1x32x128xf32>
      %46 = vector.shape_cast %45 : vector<1x32x128xf32> to vector<32x128xf32>
      %47 = arith.truncf %46 : vector<32x128xf32> to vector<32x128xbf16>
      %cst_31 = arith.constant dense<0.000000e+00> : vector<4x128xf32>
      %48 = tpu.matmul %44, %47, %cst_31 {dimension_numbers = #tpu.dot_dimension_numbers<[1], [0], [0], [1], [0, 0, 1, 1], [], []>} : vector<4x32xbf16>, vector<32x128xbf16>, vector<4x128xf32> -> vector<4x128xf32>
      %c0_32 = arith.constant 0 : index
      %c0_33 = arith.constant 0 : index
      %49 = vector.load %arg6[%c0_32, %c0_33] : memref<4x1xf32, #tpu.memory_space<vmem>>, vector<4x1xf32>
      %50 = vector.broadcast %49 : vector<4x1xf32> to vector<4x128xf32>
      %51 = arith.addf %48, %50 : vector<4x128xf32>
      %52 = tpu.transpose %51, [1, 0] : vector<4x128xf32> -> vector<128x4xf32>
      %53 = arith.truncf %52 : vector<128x4xf32> to vector<128x4xbf16>
      %c0_34 = arith.constant 0 : index
      %c0_35 = arith.constant 0 : index
      %54 = vector.load %arg11[%c0_34, %c0_35] : memref<128x4xbf16, #tpu.memory_space<vmem>>, vector<128x4xbf16>
      tpu.vector_store %arg11[%c0_34, %c0_35], %53 {strides = array<i32>} : memref<128x4xbf16, #tpu.memory_space<vmem>>, vector<128x4xbf16>,
      %cst_36 = arith.constant 0xFF800000 : f32
      %55 = vector.broadcast %cst_36 : f32 to vector<128x1xf32>
      %c0_37 = arith.constant 0 : index
      %c0_38 = arith.constant 0 : index
      %56 = vector.load %arg12[%c0_37, %c0_38] : memref<128x1xf32, #tpu.memory_space<vmem>>, vector<128x1xf32>
      tpu.vector_store %arg12[%c0_37, %c0_38], %55 {strides = array<i32>} : memref<128x1xf32, #tpu.memory_space<vmem>>, vector<128x1xf32>,
      %cst_39 = arith.constant 0.000000e+00 : f32
      %57 = vector.broadcast %cst_39 : f32 to vector<128x1xf32>
      %c0_40 = arith.constant 0 : index
      %c0_41 = arith.constant 0 : index
      %58 = vector.load %arg13[%c0_40, %c0_41] : memref<128x1xf32, #tpu.memory_space<vmem>>, vector<128x1xf32>
      tpu.vector_store %arg13[%c0_40, %c0_41], %57 {strides = array<i32>} : memref<128x1xf32, #tpu.memory_space<vmem>>, vector<128x1xf32>,
      %cst_42 = arith.constant 0.000000e+00 : f32
      %59 = vector.broadcast %cst_42 : f32 to vector<128x32xf32>
      %c0_43 = arith.constant 0 : index
      %c0_44 = arith.constant 0 : index
      %60 = vector.load %arg14[%c0_43, %c0_44] : memref<128x32xf32, #tpu.memory_space<vmem>>, vector<128x32xf32>
      tpu.vector_store %arg14[%c0_43, %c0_44], %59 {strides = array<i32>} : memref<128x32xf32, #tpu.memory_space<vmem>>, vector<128x32xf32>,
    } else {
    }
    %c0 = arith.constant 0 : index
    %c0_1 = arith.constant 0 : index
    %3 = vector.load %arg7[%c0, %c0_1] : memref<36x32xf32, #tpu.memory_space<vmem>>, vector<36x32xf32>
    %4 = arith.truncf %3 : vector<36x32xf32> to vector<36x32xbf16>
    %c0_2 = arith.constant 0 : index
    %c0_3 = arith.constant 0 : index
    %c0_4 = arith.constant 0 : index
    %5 = vector.load %arg4[%c0_2, %c0_3, %c0_4] : memref<1x32x128xf32, #tpu.memory_space<vmem>>, vector<1x32x128xf32>
    %6 = vector.shape_cast %5 : vector<1x32x128xf32> to vector<32x128xf32>
    %7 = arith.truncf %6 : vector<32x128xf32> to vector<32x128xbf16>
    %cst = arith.constant dense<0.000000e+00> : vector<36x128xf32>
    %8 = tpu.matmul %4, %7, %cst {dimension_numbers = #tpu.dot_dimension_numbers<[1], [0], [0], [1], [0, 0, 1, 1], [], []>} : vector<36x32xbf16>, vector<32x128xbf16>, vector<36x128xf32> -> vector<36x128xf32>
    %c0_5 = arith.constant 0 : index
    %c0_6 = arith.constant 0 : index
    %9 = vector.load %arg8[%c0_5, %c0_6] : memref<36x1xf32, #tpu.memory_space<vmem>>, vector<36x1xf32>
    %10 = vector.broadcast %9 : vector<36x1xf32> to vector<36x128xf32>
    %11 = arith.addf %8, %10 : vector<36x128xf32>
    %12 = arith.truncf %11 : vector<36x128xf32> to vector<36x128xbf16>
    %13 = vector.extract_strided_slice %12 {offsets = [0, 0], sizes = [32, 128], strides = [1, 1]} : vector<36x128xbf16> to vector<32x128xbf16>
    %14 = vector.extract_strided_slice %12 {offsets = [32, 0], sizes = [4, 128], strides = [1, 1]} : vector<36x128xbf16> to vector<4x128xbf16>
    %c0_7 = arith.constant 0 : index
    %c0_8 = arith.constant 0 : index
    %15 = vector.load %arg11[%c0_7, %c0_8] : memref<128x4xbf16, #tpu.memory_space<vmem>>, vector<128x4xbf16>
    %cst_9 = arith.constant dense<0.000000e+00> : vector<128x128xf32>
    %16 = tpu.matmul %15, %14, %cst_9 {dimension_numbers = #tpu.dot_dimension_numbers<[1], [0], [0], [1], [0, 0, 1, 1], [], []>} : vector<128x4xbf16>, vector<4x128xbf16>, vector<128x128xf32> -> vector<128x128xf32>
    %c0_10 = arith.constant 0 : index
    %c0_11 = arith.constant 0 : index
    %17 = vector.load %arg12[%c0_10, %c0_11] : memref<128x1xf32, #tpu.memory_space<vmem>>, vector<128x1xf32>
    %cst_12 = arith.constant dense<0xFF800000> : vector<128xf32>
    %18 = vector.multi_reduction <maximumf>, %16, %cst_12 [1] : vector<128x128xf32> to vector<128xf32>
    %19 = vector.shape_cast %18 : vector<128xf32> to vector<128x1xf32>
    %20 = arith.maximumf %17, %19 : vector<128x1xf32>
    %21 = arith.subf %17, %20 : vector<128x1xf32>
    %22 = math.exp %21 : vector<128x1xf32>
    %23 = vector.broadcast %20 : vector<128x1xf32> to vector<128x128xf32>
    %24 = arith.subf %16, %23 : vector<128x128xf32>
    %25 = math.exp %24 : vector<128x128xf32>
    %c0_13 = arith.constant 0 : index
    %c0_14 = arith.constant 0 : index
    %26 = vector.load %arg13[%c0_13, %c0_14] : memref<128x1xf32, #tpu.memory_space<vmem>>, vector<128x1xf32>
    %27 = arith.mulf %22, %26 : vector<128x1xf32>
    %cst_15 = arith.constant dense<0.000000e+00> : vector<128xf32>
    %28 = vector.multi_reduction <add>, %25, %cst_15 [1] : vector<128x128xf32> to vector<128xf32>
    %29 = vector.shape_cast %28 : vector<128xf32> to vector<128x1xf32>
    %30 = arith.addf %27, %29 : vector<128x1xf32>
    %c0_16 = arith.constant 0 : index
    %c0_17 = arith.constant 0 : index
    %31 = vector.load %arg13[%c0_16, %c0_17] : memref<128x1xf32, #tpu.memory_space<vmem>>, vector<128x1xf32>
    tpu.vector_store %arg13[%c0_16, %c0_17], %30 {strides = array<i32>} : memref<128x1xf32, #tpu.memory_space<vmem>>, vector<128x1xf32>,
    %c0_18 = arith.constant 0 : index
    %c0_19 = arith.constant 0 : index
    %32 = vector.load %arg14[%c0_18, %c0_19] : memref<128x32xf32, #tpu.memory_space<vmem>>, vector<128x32xf32>
    %33 = vector.broadcast %22 : vector<128x1xf32> to vector<128x32xf32>
    %34 = arith.mulf %33, %32 : vector<128x32xf32>
    %35 = arith.truncf %25 : vector<128x128xf32> to vector<128x128xbf16>
    %cst_20 = arith.constant dense<0.000000e+00> : vector<128x32xf32>
    %36 = tpu.matmul %35, %13, %cst_20 {dimension_numbers = #tpu.dot_dimension_numbers<[1], [1], [0], [0], [0, 0, 1, 0], [], []>} : vector<128x128xbf16>, vector<32x128xbf16>, vector<128x32xf32> -> vector<128x32xf32>
    %37 = arith.addf %34, %36 : vector<128x32xf32>
    %c0_21 = arith.constant 0 : index
    %c0_22 = arith.constant 0 : index
    %38 = vector.load %arg14[%c0_21, %c0_22] : memref<128x32xf32, #tpu.memory_space<vmem>>, vector<128x32xf32>
    tpu.vector_store %arg14[%c0_21, %c0_22], %37 {strides = array<i32>} : memref<128x32xf32, #tpu.memory_space<vmem>>, vector<128x32xf32>,
    %c0_23 = arith.constant 0 : index
    %c0_24 = arith.constant 0 : index
    %39 = vector.load %arg12[%c0_23, %c0_24] : memref<128x1xf32, #tpu.memory_space<vmem>>, vector<128x1xf32>
    tpu.vector_store %arg12[%c0_23, %c0_24], %20 {strides = array<i32>} : memref<128x1xf32, #tpu.memory_space<vmem>>, vector<128x1xf32>,
    %c1_i32 = arith.constant 1 : i32
    %40 = arith.cmpi eq, %arg2, %c1_i32 : i32
    %41 = arith.extui %40 : i1 to i32
    %c0_i32_25 = arith.constant 0 : i32
    %42 = arith.cmpi ne, %41, %c0_i32_25 : i32
    scf.if %42 {
      %c0_26 = arith.constant 0 : index
      %c0_27 = arith.constant 0 : index
      %43 = vector.load %arg13[%c0_26, %c0_27] : memref<128x1xf32, #tpu.memory_space<vmem>>, vector<128x1xf32>
      %44 = tpu.reciprocal %43 {approx = true} : vector<128x1xf32> -> vector<128x1xf32>
      %c0_28 = arith.constant 0 : index
      %c0_29 = arith.constant 0 : index
      %45 = vector.load %arg14[%c0_28, %c0_29] : memref<128x32xf32, #tpu.memory_space<vmem>>, vector<128x32xf32>
      %46 = vector.broadcast %44 : vector<128x1xf32> to vector<128x32xf32>
      %47 = arith.mulf %45, %46 : vector<128x32xf32>
      %48 = tpu.transpose %47, [1, 0] : vector<128x32xf32> -> vector<32x128xf32>
      %c0_30 = arith.constant 0 : index
      %49 = memref.load %arg9[%c0_30] : memref<1xf32, #tpu.memory_space<smem>>
      %50 = vector.broadcast %49 : f32 to vector<32x128xf32>
      %51 = arith.mulf %50, %48 : vector<32x128xf32>
      %c0_31 = arith.constant 0 : index
      %c0_32 = arith.constant 0 : index
      %c0_33 = arith.constant 0 : index
      %52 = vector.load %arg3[%c0_31, %c0_32, %c0_33] : memref<1x32x128xf32, #tpu.memory_space<vmem>>, vector<1x32x128xf32>
      %53 = vector.shape_cast %52 : vector<1x32x128xf32> to vector<32x128xf32>
      %54 = arith.addf %51, %53 : vector<32x128xf32>
      %c0_34 = arith.constant 0 : index
      %c0_35 = arith.constant 0 : index
      %c0_36 = arith.constant 0 : index
      %55 = vector.load %arg10[%c0_34, %c0_35, %c0_36] : memref<1x32x128xf32, #tpu.memory_space<vmem>>, vector<1x32x128xf32>
      %56 = vector.shape_cast %55 : vector<1x32x128xf32> to vector<32x128xf32>
      %57 = vector.shape_cast %54 : vector<32x128xf32> to vector<1x32x128xf32>
      tpu.vector_store %arg10[%c0_34, %c0_35, %c0_36], %57 {strides = array<i32>} : memref<1x32x128xf32, #tpu.memory_space<vmem>>, vector<1x32x128xf32>,
    } else {
    }
    return
  }
  func.func @transform_0(%arg0: i32, %arg1: i32, %arg2: i32) -> (i32, i32, i32) {
    %c0_i32 = arith.constant 0 : i32
    %c0_i32_0 = arith.constant 0 : i32
    return %arg0, %c0_i32, %arg1 : i32, i32, i32
  }
  func.func @transform_1(%arg0: i32, %arg1: i32, %arg2: i32) -> (i32, i32, i32) {
    %c0_i32 = arith.constant 0 : i32
    %c0_i32_0 = arith.constant 0 : i32
    return %arg0, %c0_i32, %arg2 : i32, i32, i32
  }
  func.func @transform_2(%arg0: i32, %arg1: i32, %arg2: i32) -> (i32, i32) {
    %c0_i32 = arith.constant 0 : i32
    %c0_i32_0 = arith.constant 0 : i32
    %c0_i32_1 = arith.constant 0 : i32
    return %c0_i32, %c0_i32_0 : i32, i32
  }
  func.func @transform_3(%arg0: i32, %arg1: i32, %arg2: i32) -> (i32, i32) {
    %c0_i32 = arith.constant 0 : i32
    %c0_i32_0 = arith.constant 0 : i32
    %c0_i32_1 = arith.constant 0 : i32
    return %c0_i32, %c0_i32_0 : i32, i32
  }
  func.func @transform_4(%arg0: i32, %arg1: i32, %arg2: i32) -> (i32, i32) {
    %c0_i32 = arith.constant 0 : i32
    %c0_i32_0 = arith.constant 0 : i32
    %c0_i32_1 = arith.constant 0 : i32
    return %c0_i32, %c0_i32_0 : i32, i32
  }
  func.func @transform_5(%arg0: i32, %arg1: i32, %arg2: i32) -> (i32, i32) {
    %c0_i32 = arith.constant 0 : i32
    %c0_i32_0 = arith.constant 0 : i32
    %c0_i32_1 = arith.constant 0 : i32
    return %c0_i32, %c0_i32_0 : i32, i32
  }
  func.func @transform_6(%arg0: i32, %arg1: i32, %arg2: i32) -> i32 {
    %c0_i32 = arith.constant 0 : i32
    %c0_i32_0 = arith.constant 0 : i32
    return %c0_i32 : i32
  }
  func.func @transform_7(%arg0: i32, %arg1: i32, %arg2: i32) -> (i32, i32, i32) {
    %c0_i32 = arith.constant 0 : i32
    %c0_i32_0 = arith.constant 0 : i32
    return %arg0, %c0_i32, %arg1 : i32, i32, i32
  }
}

</mosaic_0001>

<bundles_post_ra>
// kernel: tpu_custom_call.1
= control target key start
LH: loop header
LB: loop body
LE: loop exit
PB: predicated region body
PF: predicated region fallthrough
CT: control target
= control target key end

     0   :  { %s3240_s0 = inlined_call_operand.hbm [shape: f32[2,32,256], index: 0, kind: input, shape index: {}]   ;;  %s3241_s1 = inlined_call_operand.hbm [shape: f32[2,32,256], index: 1, kind: input, shape index: {}]   ;;  %s3242_s2 = inlined_call_operand.vmem [shape: f32[4,32], index: 2, kind: input, shape index: {}]   ;;  %s3243_s3 = inlined_call_operand.vmem [shape: f32[4,1], index: 3, kind: input, shape index: {}]   ;;  %s3244_s4 = inlined_call_operand.vmem [shape: f32[36,32], index: 4, kind: input, shape index: {}]   ;;  %s3245_s5 = inlined_call_operand.vmem [shape: f32[36,1], index: 5, kind: input, shape index: {}]   ;;  %s3246_s6 = inlined_call_operand.<no memory space> [shape: f32[1], index: 6, kind: input, shape index: {}]   ;;  %s3247_s7 = inlined_call_operand.hbm [shape: f32[2,32,256], index: 7, kind: output, shape index: {}]  }
   0x1   :  { %3263 = sst [smem:[#allocation25_spill]] %s3240_s0 }
   0x2   :  { %3264 = sst [smem:[#allocation26_spill]] %s3245_s5 }
   0x3   :  { %3265 = sst [smem:[#allocation27_spill]] %s3247_s7 }
   0x4   :  { %12 = sst [smem:[#allocation6]] %s3246_s6 }
   0x5   :  { %13 = vsyncpa [#allocation8], 0 }
   0x6   :  { %15 = vsyncpa [#allocation8 + $0x1], 0 }
   0x7   :  { %16 = vsyncpa [#allocation11], 0 }
   0x8   :  { %18 = vsyncpa [#allocation11 + $0x1], 0 }
   0x9   :  { %19 = vsyncpa [#allocation9], 0 }
   0xa   :  { %21 = vsyncpa [#allocation9 + $0x1], 0  ;;  %s2490_s26 = smov 0   ;;  %s2492_s27 = smov 0  }
   0xb   :  { %s2494_s28 = smov 0   ;;  %s2496_s29 = smov 0  }
   0xc   :  { %s2498_s30 = smov 0   ;;  %s2500_s8 = smov 0  }
   0xd   :  { %s2502_s9 = smov 0   ;;  %s2504_s6 = smov 0  }
   0xe   :  { %s2506_s10 = smov 0   ;;  %s2508_s11 = smov 0  }
   0xf   :  { %s2510_s12 = smov 0   ;;  %s2512_s13 = smov 0  }
  0x10   :  { %s2514_s14 = smov 0  }
  0x11 LB: > { %3266 = sst [smem:[#allocation16_spill]] %s2392_s29  ;;  %s1819_s15 = sadd.s32 4294967295, %s2428_s14   ;;  %s2428_s14 = sphi %s2514_s14, %s27_s14   ;;  %s2424_s13 = sphi %s2512_s13, %s3317_s13   ;;  %s2420_s12 = sphi %s2510_s12, %s3308_s12   ;;  %s2416_s11 = sphi %s2508_s11, %s3307_s11   ;;  %s2412_s10 = sphi %s2506_s10, %s3316_s10   ;;  %s2408_s6 = sphi %s2504_s6, %s3306_s6   ;;  %s2404_s9 = sphi %s2502_s9, %s3305_s9   ;;  %s2400_s8 = sphi %s2500_s8, %s3315_s8   ;;  %s2396_s30 = sphi %s2498_s30, %s3314_s30   ;;  %s2392_s29 = sphi %s2496_s29, %s3313_s29   ;;  %s2388_s28 = sphi %s2494_s28, %s3312_s28   ;;  %s2384_s27 = sphi %s2492_s27, %s3311_s27   ;;  %s2380_s26 = sphi %s2490_s26, %s3310_s26  }
  0x12   : > { %3267 = sst [smem:[#allocation17_spill]] %s2408_s6  ;;  %s1820_s16 = sadd.s32 4294967294, %s2428_s14  }
  0x13   : > { %3268 = sst [smem:[#allocation18_spill]] %s2412_s10  ;;  %p62_p0 = scmp.ne.s32.totalorder %s2400_s8, %s2396_s30 }
  0x14   : > { %3269 = sst [smem:[#allocation19_spill]] %s2416_s11  ;;  %p3254_p1 = scmp.eq.s32.totalorder %s2428_s14, 0 }
  0x15   : > { %3270 = sst [smem:[#allocation20_spill]] %s2420_s12  ;;  %p68_p2 = scmp.ne.s32.totalorder %s2396_s30, %s2392_s29 }
  0x16   : > { %p2564_p3 = scmp.eq.s32.totalorder %s1819_s15, 0  ;;  %p227_p4 = scmp.eq.s32.totalorder %s1819_s15, 7 }
  0x17   : > { %p2570_p5 = por %p3254_p1, %p62_p0  ;;  %p233_p6 = scmp.eq.s32.totalorder %s1820_s16, 7 }
  0x18   : > { %p2576_p7 = por %p2564_p3, %p68_p2  ;;  %p2580_p8 = por %p227_p4, %p62_p0 }
  0x19   : > { %p2584_p9 = por %p233_p6, %p68_p2  ;;  %p2003_p10 = scmp.lt.s32.totalorder %s2428_s14, 8 }
  0x1a   : > { %s3274_s22 = scalar_select %p2580_p8, 1, 0 }
  0x1b   : > { %s3276_s23 = scalar_select %p2584_p9, 1, 0 }
  0x1c   : > { %3275 = sst [smem:[#allocation21_spill]] %s3274_s22  ;;  %s268_s24 = sand.u32 1, %s2400_s8  }
  0x1d   : > { %3277 = sst [smem:[#allocation22_spill]] %s3276_s23  ;;  %s1823_s25 = sshll.u32 %s268_s24, 5 }
  0x1e   : > { %s1824_s15 = sshll.u32 %s2424_s13, 3  ;;  %s272_s16 = scalar_lea.vmem [#allocation7], %s1823_s25 }
  0x1f   : > { %s277_s18 = sadd.s32 %s2420_s12, %s1824_s15  ;;  %s280_s17 = sshll.u32 %s272_s16, 4  ;;  %s281_s17 = int_to_ptr.vmem [resolvable:$true] %s280_s17 }
  0x20   : > { %s1825_s29 = sshll.u32 %s277_s18, 7  ;;  %s3278_s0 = sld [smem:[#allocation25_spill]] }
  0x21   : > { %p2601_p11 = pnand %p2003_p10, %p2570_p5  ;;  %s269_s23 = scalar_lea.sflag [#allocation8], %s268_s24 }
  0x22   : > { %s2245_s5 = scalar_lea.vmem %s281_s17, 512  ;;  %s2430_s18 = smov [#allocation7]  }
  0x23   : > { %p2234_p12 = pneg %p2601_p11  ;;  %p2246_p13 = scmp.ne.s32.totalorder %s281_s17, %s2245_s5 }
  0x24   : > { %s2250_s25 = sshll.u32 %s2430_s18, 4  ;;  %s2251_s25 = int_to_ptr.vmem [resolvable:$false] %s2250_s25 }
  0x25   : > { %p2248_p0 = pnand %p2246_p13, %p2234_p12  ;;  %s2252_s16 = scalar_lea.vmem %s2251_s25, 1024 }
  0x26   : > { %s279_s10 = scalar_lea.hbm %s3278_s0, %s1825_s29  ;;  %p2253_p4 = scmp.lt.s32.totalorder %s281_s17, %s2251_s25 }
  0x27   : > { %p2249_p2 = pneg %p2248_p0  ;;  %p2254_p6 = scmp.lt.s32.totalorder %s2252_s16, %s2245_s5 }
  0x29   : > { %p2255_p1 = por %p2254_p6, %p2253_p4 }
  0x2b   : > { %p2256_p9 = pnand %p2255_p1, %p2249_p2 }
  0x2d   : > { %2259 = shalt.err (!%p2256_p9)
}
  0x2e   : > { %s3255_s7 = smov 256   ;;  %s3256_s29 = smov 128  }
  0x2f   : > { %s3257_s5 = smov 8   ;;  %p1829_p1 = scmp.ge.s32.totalorder %s2428_s14, 1 }
  0x30   : > { %1995 = dma.hbm_to_vmem [thread:$0]  (!%p2601_p11), %s279_s10, 512, %s281_s17, %s269_s23, %s3255_s7, %s3256_s29, %s3257_s5  }
  0x31   : > { %p310_p5 = scmp.lt.s32.totalorder %s2428_s14, 9  ;;  %s39_s24 = sadd.s32 1, %s2416_s11 }
  0x32   : > { %p40_p12 = scmp.ge.s32.totalorder %s39_s24, 2  ;;  %p96_p13 = scmp.ne.s32.totalorder %s2384_s27, %s2380_s26 }
  0x33   : > { %p2615_p9 = pnand %p1829_p1, %p310_p5  ;;  %s3282_s10 = sadd.s32 1, %s2420_s12 }
  0x34   : > { %s3319_s24 = smov (%p40_p12, %s39_s24), 0  ;;  %s3321_s10 = smov (!%p40_p12, %s3282_s10), %s2420_s12 }
  0x35   : > { %3281 = sst [smem:[#allocation23_spill]] %s3319_s24  ;;  %s79_s17 = ssub.s32 %s2416_s11, %s3319_s24 }
  0x36   : > { %p90_p11 = scmp.ne.s32.totalorder %s2388_s28, %s2384_s27  ;;  %p44_p0 = scmp.ge.s32.totalorder %s3321_s10, 2 }
  0x37   : > { %p2634_p2 = por %p96_p13, %p2564_p3  ;;  %s290_s18 = sand.u32 1, %s2388_s28  }
  0x38   : > { %s299_s25 = sadd.s32 %s2416_s11, %s1824_s15  ;;  %s3323_s10 = smov (%p44_p0, %s3321_s10), 0 }
  0x39   : > { %3284 = sst [smem:[#allocation24_spill]] %s3323_s10  ;;  %s3285_s26 = sadd.s32 1, %s2424_s13 }
  0x3a   : > { %s3325_s26 = smov (!%p44_p0, %s3285_s26), %s2424_s13  ;;  %s51_s16 = ssub.s32 %s2420_s12, %s3323_s10 }
  0x3b   : > { %p3286_p4 = scmp.eq.s32.totalorder %s2428_s14, 0  ;;  %p48_p3 = scmp.ge.s32.totalorder %s3325_s26, 2 }
  0x3c   : > { %s1826_s19 = sshll.u32 %s290_s18, 5  ;;  %s1828_s15 = sshll.u32 %s299_s25, 7 }
  0x3d   : > { %p2651_p6 = por %p90_p11, %p3286_p4  ;;  %s3327_s26 = smov (%p48_p3, %s3325_s26), 0 }
  0x3e   : > { %s2660_s22 = scalar_lea.hbm %s3241_s1, %s1828_s15  ;;  %s50_s6 = ssub.s32 %s2424_s13, %s3327_s26 }
  0x3f   : > { %s294_s0 = scalar_lea.vmem [#allocation10], %s1826_s19  ;;  %s52_s24 = sor.u32 %s51_s16, %s50_s6 }
  0x40   : > { %s302_s10 = sshll.u32 %s294_s0, 4  ;;  %s80_s12 = sor.u32 %s79_s17, %s50_s6  ;;  %s303_s10 = int_to_ptr.vmem [resolvable:$true] %s302_s10 }
  0x41   : > { %p53_p1 = scmp.eq.s32.totalorder %s52_s24, 0  ;;  %p81_p5 = scmp.eq.s32.totalorder %s80_s12, 0 }
  0x42   : > { %p2668_p12 = pnand %p2003_p10, %p2651_p6  ;;  %s3289_s11 = sadd.s32 1, %s2400_s8 }
  0x43   : > { %s2675_s29 = scalar_select %p53_p1, %s2400_s8, %s3289_s11  }
  0x44   : > { %s3290_s5 = sadd.s32 1, %s2388_s28  ;;  %s291_s19 = scalar_lea.sflag [#allocation11], %s290_s18 }
  0x45   : > { %s2680_s15 = scalar_select %p81_p5, %s2388_s28, %s3290_s5  }
  0x46   : > { %p2262_p13 = pneg %p2668_p12  ;;  %s2273_s0 = scalar_lea.vmem %s303_s10, 512 }
  0x47   : > { %p2274_p11 = scmp.ne.s32.totalorder %s303_s10, %s2273_s0  ;;  %s2434_s12 = smov [#allocation10]  }
  0x48   : > { %s2278_s7 = sshll.u32 %s2434_s12, 4  ;;  %s2279_s7 = int_to_ptr.vmem [resolvable:$false] %s2278_s7 }
  0x49   : > { %p2276_p0 = pnand %p2274_p11, %p2262_p13  ;;  %s2280_s6 = scalar_lea.vmem %s2279_s7, 1024 }
  0x4a   : > { %p2281_p10 = scmp.lt.s32.totalorder %s303_s10, %s2279_s7  ;;  %p2282_p6 = scmp.lt.s32.totalorder %s2280_s6, %s2273_s0 }
  0x4b   : > { %p2277_p4 = pneg %p2276_p0 }
  0x4c   : > { %p2283_p3 = por %p2282_p6, %p2281_p10 }
  0x4e   : > { %p2284_p8 = pnand %p2283_p3, %p2277_p4 }
  0x50   : > { %2287 = shalt.err (!%p2284_p8)
}
  0x51   : > { %s3291_s11 = smov 8   ;;  %s3292_s24 = smov 128  }
  0x52   : > { %s3293_s17 = smov 256   ;;  %314 = sbr.rel (%p2615_p9) target bundleno = 1740 (0x6cc), region = 48 }
  0x53   : > { %1998 = dma.hbm_to_vmem [thread:$0]  (!%p2668_p12), %s2660_s22, 512, %s303_s10, %s291_s19, %s3293_s17, %s3292_s24, %s3291_s11  }
  0x54   : > { %s2693_s18 = sand.u32 (!%p2615_p9), 1, %s2396_s30  }
  0x55   : > { %s1830_s16 = sshll.u32 (!%p2615_p9), %s2693_s18, 5  ;;  %s317_s5 = scalar_lea.sflag (!%p2615_p9), [#allocation8], %s2693_s18 }
  0x56   : > { %s2697_s0 = scalar_lea.vmem (!%p2615_p9), [#allocation7], %s1830_s16 }
  0x57   : > { %2367 = dma.done.wait (%p2576_p7), %s317_s5, 512  }
  0x58   : > { %2369 = vsyncadd (%p2576_p7), %s317_s5, 4294966784  ;;  %s325_s22 = sand.u32 1, %s2384_s27  }
  0x59   : > { %s1831_s20 = sshll.u32 %s325_s22, 5  ;;  %s326_s10 = scalar_lea.sflag [#allocation11], %s325_s22 }
  0x5a   : > { %s2704_s25 = scalar_lea.vmem [#allocation10], %s1831_s20 }
  0x5b   : > { %2371 = dma.done.wait (%p2634_p2), %s326_s10, 512  }
  0x5c   : > { %2373 = vsyncadd (%p2634_p2), %s326_s10, 4294966784  ;;  %s2710_s19 = scalar_lea.vmem [#allocation12], %s1830_s16  ;;  %p1833_p8 = scmp.ne.s32.totalorder %s2404_s9, 0 }
  0x5e   : > { %369 = sbr.rel (%p1833_p8) target bundleno = 492 (0x1ec), region = 60 }
  0x63   : > { %vm541_vm0 = vcmask 7168   ;;  %v374_v0 = vld [vmem:[%s2697_s0 + $0x10] sm:$0xff]  ;;  %v375_v1 = vld [vmem:[%s2697_s0 + $0x18] sm:$0xff]  ;;  %v2716_v2 = vld [vmem:[%s2697_s0] sm:$0xff]  ;;  %v2435_v3 = vmov 0.0   ;;  %v2436_v4 = vmov -inf  }
  0x64   : > { %1919 = vmatprep.subr.bf16.mxu0 %v2435_v3  ;;  %542 = vst.msk [vmem:[#allocation3] sm:$0xff] %vm541_vm0, %v2436_v4  ;;  %543 = vst.msk [vmem:[#allocation3 + $0x8] sm:$0xff] %vm541_vm0, %v2436_v4  ;;  %v377_v5 = vpack.c.bf16 %v375_v1, %v374_v0  ;;  %v373_v6 = vld [vmem:[%s2697_s0 + $0x8] sm:$0xff]  ;;  %vm384_vm1 = vcmask 261120   ;;  %vm2437_vm2 = vmmov 0   ;;  %v2438_v7 = vmov 0  }
  0x65   : > { %544 = vst.msk [vmem:[#allocation3 + $0x10] sm:$0xff] %vm541_vm0, %v2436_v4  ;;  %545 = vst.msk [vmem:[#allocation3 + $0x18] sm:$0xff] %vm541_vm0, %v2436_v4  ;;  %1923 = vmatprep.mubr.msk.bf16.mxu0 %vm2437_vm2, %v2435_v3  ;;  %2123 = vset.pattern.permute.xlu0 %v2438_v7  ;;  %v378_v8 = vld [vmem:[%s3243_s3] sm:$0xf]  ;;  %v376_v9 = vpack.c.bf16 %v373_v6, %v2716_v2  ;;  %vm524_vm3 = vcmask 27648  }
  0x66   : > { %546 = vst.msk [vmem:[#allocation3 + $0x20] sm:$0xff] %vm541_vm0, %v2436_v4  ;;  %547 = vst.msk [vmem:[#allocation3 + $0x28] sm:$0xff] %vm541_vm0, %v2436_v4  ;;  %1920 = vmatpush3.bf16.msra.mxu0 %v377_v5  ;;  %v370_v10 = vld [vmem:[%s3242_s2] sm:$0xf]  ;;  %381 = vperm.xlu0 %2123, %v378_v8  }
  0x67   : > { %548 = vst.msk [vmem:[#allocation3 + $0x30] sm:$0xff] %vm541_vm0, %v2436_v4  ;;  %549 = vst.msk [vmem:[#allocation3 + $0x38] sm:$0xff] %vm541_vm0, %v2436_v4  ;;  %1921 = vmatprep.subr.bf16.mxu0 %v2435_v3  ;;  %v371_v11 = vpack.c.bf16 %v370_v10, %v370_v10 }
  0x68   : > { %550 = vst.msk [vmem:[#allocation3 + $0x40] sm:$0xff] %vm541_vm0, %v2436_v4  ;;  %551 = vst.msk [vmem:[#allocation3 + $0x48] sm:$0xff] %vm541_vm0, %v2436_v4 }
  0x69   : > { %552 = vst.msk [vmem:[#allocation3 + $0x50] sm:$0xff] %vm541_vm0, %v2436_v4  ;;  %553 = vst.msk [vmem:[#allocation3 + $0x58] sm:$0xff] %vm541_vm0, %v2436_v4 }
  0x6a   : > { %554 = vst.msk [vmem:[#allocation3 + $0x60] sm:$0xff] %vm541_vm0, %v2436_v4  ;;  %555 = vst.msk [vmem:[#allocation3 + $0x68] sm:$0xff] %vm541_vm0, %v2436_v4  ;;  %1922 = vmatpush3.bf16.msra.mxu0 %v376_v9 }
  0x6b   : > { %556 = vst.msk [vmem:[#allocation3 + $0x70] sm:$0xff] %vm541_vm0, %v2436_v4  ;;  %557 = vst.msk [vmem:[#allocation3 + $0x78] sm:$0xff] %vm541_vm0, %v2436_v4 }
  0x6c   : > { %558 = vst.msk [vmem:[#allocation4] sm:$0xff] %vm541_vm0, %v2435_v3  ;;  %559 = vst.msk [vmem:[#allocation4 + $0x8] sm:$0xff] %vm541_vm0, %v2435_v3 }
  0x6d   : > { %560 = vst.msk [vmem:[#allocation4 + $0x10] sm:$0xff] %vm541_vm0, %v2435_v3  ;;  %561 = vst.msk [vmem:[#allocation4 + $0x18] sm:$0xff] %vm541_vm0, %v2435_v3  ;;  %1924 = vmatmul.mubr.msk.bf16.vlgmr.msra.gmra.mxu0 %vm384_vm1, %v371_v11 }
  0x6e   : > { %562 = vst.msk [vmem:[#allocation4 + $0x20] sm:$0xff] %vm541_vm0, %v2435_v3  ;;  %563 = vst.msk [vmem:[#allocation4 + $0x28] sm:$0xff] %vm541_vm0, %v2435_v3 }
  0x6f   : > { %564 = vst.msk [vmem:[#allocation4 + $0x30] sm:$0xff] %vm541_vm0, %v2435_v3  ;;  %565 = vst.msk [vmem:[#allocation4 + $0x38] sm:$0xff] %vm541_vm0, %v2435_v3 }
  0x70   : > { %566 = vst.msk [vmem:[#allocation4 + $0x40] sm:$0xff] %vm541_vm0, %v2435_v3  ;;  %567 = vst.msk [vmem:[#allocation4 + $0x48] sm:$0xff] %vm541_vm0, %v2435_v3 }
  0x71   : > { %568 = vst.msk [vmem:[#allocation4 + $0x50] sm:$0xff] %vm541_vm0, %v2435_v3  ;;  %569 = vst.msk [vmem:[#allocation4 + $0x58] sm:$0xff] %vm541_vm0, %v2435_v3 }
  0x72   : > { %570 = vst.msk [vmem:[#allocation4 + $0x60] sm:$0xff] %vm541_vm0, %v2435_v3  ;;  %571 = vst.msk [vmem:[#allocation4 + $0x68] sm:$0xff] %vm541_vm0, %v2435_v3 }
  0x73   : > { %572 = vst.msk [vmem:[#allocation4 + $0x70] sm:$0xff] %vm541_vm0, %v2435_v3  ;;  %573 = vst.msk [vmem:[#allocation4 + $0x78] sm:$0xff] %vm541_vm0, %v2435_v3 }
  0x74   : > { %574 = vst.msk [vmem:[#allocation5] sm:$0xff] %vm384_vm1, %v2435_v3  ;;  %575 = vst.msk [vmem:[#allocation5 + $0x8] sm:$0xff] %vm384_vm1, %v2435_v3 }
  0x75   : > { %576 = vst.msk [vmem:[#allocation5 + $0x10] sm:$0xff] %vm384_vm1, %v2435_v3  ;;  %577 = vst.msk [vmem:[#allocation5 + $0x18] sm:$0xff] %vm384_vm1, %v2435_v3 }
  0x76   : > { %578 = vst.msk [vmem:[#allocation5 + $0x20] sm:$0xff] %vm384_vm1, %v2435_v3  ;;  %579 = vst.msk [vmem:[#allocation5 + $0x28] sm:$0xff] %vm384_vm1, %v2435_v3 }
  0x77   : > { %580 = vst.msk [vmem:[#allocation5 + $0x30] sm:$0xff] %vm384_vm1, %v2435_v3  ;;  %581 = vst.msk [vmem:[#allocation5 + $0x38] sm:$0xff] %vm384_vm1, %v2435_v3 }
  0x78   : > { %582 = vst.msk [vmem:[#allocation5 + $0x40] sm:$0xff] %vm384_vm1, %v2435_v3  ;;  %583 = vst.msk [vmem:[#allocation5 + $0x48] sm:$0xff] %vm384_vm1, %v2435_v3 }
  0x79   : > { %584 = vst.msk [vmem:[#allocation5 + $0x50] sm:$0xff] %vm384_vm1, %v2435_v3  ;;  %585 = vst.msk [vmem:[#allocation5 + $0x58] sm:$0xff] %vm384_vm1, %v2435_v3 }
  0x7a   : > { %586 = vst.msk [vmem:[#allocation5 + $0x60] sm:$0xff] %vm384_vm1, %v2435_v3  ;;  %587 = vst.msk [vmem:[#allocation5 + $0x68] sm:$0xff] %vm384_vm1, %v2435_v3 }
  0x7b   : > { %588 = vst.msk [vmem:[#allocation5 + $0x70] sm:$0xff] %vm384_vm1, %v2435_v3  ;;  %589 = vst.msk [vmem:[#allocation5 + $0x78] sm:$0xff] %vm384_vm1, %v2435_v3 }
  0xe1   : > { %v382_v12 = vpop.permute.xlu0 %381 }
 0x12d   : > { %v422_v13 = vpop.f32.mrf.mxu0 }
 0x12e   : > { %v423_v14 = vadd.f32 %v422_v13, %v382_v12 }
 0x12f   : > { %v1925_v15 = vpop.f32.mrf.mxu0 }
 0x130   : > { %428 = vxpose.xlu0.b32.start.end [1/1] (short) %v423_v14, 128 }
 0x131   : > { %v425_v16 = vpop.f32.mrf.mxu0 }
 0x133   : > { %v1926_v17 = vpop.f32.mrf.mxu0 }
 0x1ac   : > { %v444_v18 = vpop.trf.xlu0 }
 0x1ad   : > { %v1876_v19 = vpack.c.bf16 %v444_v18, %v444_v18 }
 0x1af   : > { %525 = vst.msk [vmem:[#allocation2] sm:$0xf] %vm524_vm3, %v1876_v19 }
 0x1b0   : > { %v445_v20 = vpop.trf.xlu0 }
 0x1b1   : > { %v1877_v21 = vpack.c.bf16 %v445_v20, %v445_v20 }
 0x1b3   : > { %526 = vst.msk [vmem:[#allocation2 + $0x4] sm:$0xf] %vm524_vm3, %v1877_v21 }
 0x1b4   : > { %v446_v22 = vpop.trf.xlu0 }
 0x1b5   : > { %v1878_v23 = vpack.c.bf16 %v446_v22, %v446_v22 }
 0x1b7   : > { %527 = vst.msk [vmem:[#allocation2 + $0x8] sm:$0xf] %vm524_vm3, %v1878_v23 }
 0x1b8   : > { %v447_v24 = vpop.trf.xlu0 }
 0x1b9   : > { %v1879_v25 = vpack.c.bf16 %v447_v24, %v447_v24 }
 0x1bb   : > { %528 = vst.msk [vmem:[#allocation2 + $0xc] sm:$0xf] %vm524_vm3, %v1879_v25 }
 0x1bc   : > { %v448_v26 = vpop.trf.xlu0 }
 0x1bd   : > { %v1880_v27 = vpack.c.bf16 %v448_v26, %v448_v26 }
 0x1bf   : > { %529 = vst.msk [vmem:[#allocation2 + $0x10] sm:$0xf] %vm524_vm3, %v1880_v27 }
 0x1c0   : > { %v449_v28 = vpop.trf.xlu0 }
 0x1c1   : > { %v1881_v29 = vpack.c.bf16 %v449_v28, %v449_v28 }
 0x1c3   : > { %530 = vst.msk [vmem:[#allocation2 + $0x14] sm:$0xf] %vm524_vm3, %v1881_v29 }
 0x1c4   : > { %v450_v30 = vpop.trf.xlu0 }
 0x1c5   : > { %v1882_v31 = vpack.c.bf16 %v450_v30, %v450_v30 }
 0x1c7   : > { %531 = vst.msk [vmem:[#allocation2 + $0x18] sm:$0xf] %vm524_vm3, %v1882_v31 }
 0x1c8   : > { %v451_v32 = vpop.trf.xlu0 }
 0x1c9   : > { %v1883_v33 = vpack.c.bf16 %v451_v32, %v451_v32 }
 0x1cb   : > { %532 = vst.msk [vmem:[#allocation2 + $0x1c] sm:$0xf] %vm524_vm3, %v1883_v33 }
 0x1cc   : > { %v452_v34 = vpop.trf.xlu0 }
 0x1cd   : > { %v1884_v35 = vpack.c.bf16 %v452_v34, %v452_v34 }
 0x1cf   : > { %533 = vst.msk [vmem:[#allocation2 + $0x20] sm:$0xf] %vm524_vm3, %v1884_v35 }
 0x1d0   : > { %v453_v36 = vpop.trf.xlu0 }
 0x1d1   : > { %v1885_v37 = vpack.c.bf16 %v453_v36, %v453_v36 }
 0x1d3   : > { %534 = vst.msk [vmem:[#allocation2 + $0x24] sm:$0xf] %vm524_vm3, %v1885_v37 }
 0x1d4   : > { %v454_v38 = vpop.trf.xlu0 }
 0x1d5   : > { %v1886_v39 = vpack.c.bf16 %v454_v38, %v454_v38 }
 0x1d7   : > { %535 = vst.msk [vmem:[#allocation2 + $0x28] sm:$0xf] %vm524_vm3, %v1886_v39 }
 0x1d8   : > { %v455_v40 = vpop.trf.xlu0 }
 0x1d9   : > { %v1887_v41 = vpack.c.bf16 %v455_v40, %v455_v40 }
 0x1db   : > { %536 = vst.msk [vmem:[#allocation2 + $0x2c] sm:$0xf] %vm524_vm3, %v1887_v41 }
 0x1dc   : > { %v456_v42 = vpop.trf.xlu0 }
 0x1dd   : > { %v1888_v43 = vpack.c.bf16 %v456_v42, %v456_v42 }
 0x1df   : > { %537 = vst.msk [vmem:[#allocation2 + $0x30] sm:$0xf] %vm524_vm3, %v1888_v43 }
 0x1e0   : > { %v457_v44 = vpop.trf.xlu0 }
 0x1e1   : > { %v1889_v45 = vpack.c.bf16 %v457_v44, %v457_v44 }
 0x1e3   : > { %538 = vst.msk [vmem:[#allocation2 + $0x34] sm:$0xf] %vm524_vm3, %v1889_v45 }
 0x1e4   : > { %v458_v46 = vpop.trf.xlu0 }
 0x1e5   : > { %v1890_v47 = vpack.c.bf16 %v458_v46, %v458_v46 }
 0x1e7   : > { %539 = vst.msk [vmem:[#allocation2 + $0x38] sm:$0xf] %vm524_vm3, %v1890_v47 }
 0x1e8   : > { %v459_v48 = vpop.trf.xlu0 }
 0x1e9   : > { %v1891_v49 = vpack.c.bf16 %v459_v48, %v459_v48 }
 0x1eb   : > { %540 = vst.msk [vmem:[#allocation2 + $0x3c] sm:$0xf] %vm524_vm3, %v1891_v49 }
 0x1ec PF: > { %v600_v50 = vld [vmem:[%s2704_s25 + $0x10] sm:$0xff]  ;;  %v601_v51 = vld [vmem:[%s2704_s25 + $0x18] sm:$0xff]  ;;  %v598_v52 = vld [vmem:[%s2704_s25] sm:$0xff]  ;;  %v2439_v53 = vmov 0.0   ;;  %vm2440_vm4 = vmmov 0   ;;  %s3294_s16 = sld [smem:[#allocation26_spill]] }
 0x1ed   : > { %1981 = vmatprep.subr.bf16.mxu1 %v2439_v53  ;;  %v603_v54 = vpack.c.bf16 %v601_v51, %v600_v50  ;;  %v599_v55 = vld [vmem:[%s2704_s25 + $0x8] sm:$0xff]  ;;  %1939 = vmatprep.mubr.msk.bf16.mxu1 %vm2440_vm4, %v2439_v53  ;;  %v594_v56 = vld [vmem:[%s3244_s4 + $0x20] sm:$0xf]  ;;  %v2441_v58 = vmov 0   ;;  %vm634_vm5 = vcmask 261120   ;;  %vm759_vm6 = vcmask 31744  }
 0x1ee   : > { %2124 = vset.pattern.permute.xlu0 %v2441_v58  ;;  %1927 = vmatprep.subr.bf16.mxu0 %v2439_v53  ;;  %v602_v59 = vpack.c.bf16 %v599_v55, %v598_v52  ;;  %v597_v60 = vpack.c.bf16 %v594_v56, %v594_v56  ;;  %v2126_v61 = vld [vmem:[#allocation2] sm:$0xff]   ;;  %v591_v63 = vld [vmem:[%s3244_s4 + $0x8] sm:$0xff]  ;;  %v592_v1 = vld [vmem:[%s3244_s4 + $0x10] sm:$0xff]  ;;  %vm784_vm7 = vcmask 1041408   ;;  %vm1205_vm8 = vcmask 7168   ;;  %p1870_p7 = scmp.ne.s32.totalorder %s2404_s9, 1 }
 0x1ef   : > { %1983 = vmatpush3.bf16.msra.mxu1 %v603_v54  ;;  %1928 = vmatpush3.bf16.msra.mxu0 %v603_v54  ;;  %v590_v62 = vld [vmem:[%s3244_s4] sm:$0xff]  ;;  %v593_v2 = vld [vmem:[%s3244_s4 + $0x18] sm:$0xff]  ;;  %v2127_v11 = vld [vmem:[#allocation2 + $0x8] sm:$0xff]   ;;  %s1667_s9 = sld [smem:[#allocation6]] (!%p1870_p7) }
 0x1f0   : > { %1982 = vmatprep.subr.bf16.mxu1 %v2439_v53  ;;  %1929 = vmatprep.subr.bf16.mxu0 %v2439_v53  ;;  %v595_v0 = vpack.c.bf16 %v591_v63, %v590_v62  ;;  %v596_v3 = vpack.c.bf16 %v593_v2, %v592_v1  ;;  %v2128_v13 = vld [vmem:[#allocation2 + $0x10] sm:$0xff]   ;;  %v2129_v14 = vld [vmem:[#allocation2 + $0x18] sm:$0xff]   ;;  %v2130_v15 = vld [vmem:[#allocation2 + $0x20] sm:$0xff]  }
 0x1f1   : > { %1931 = vmatprep.mubr.msk.bf16.mxu0 %vm2440_vm4, %v2439_v53  ;;  %2125 = vset.pattern.permute.xlu1 %v2441_v58  ;;  %v2131_v16 = vld [vmem:[#allocation2 + $0x28] sm:$0xff]   ;;  %v2132_v17 = vld [vmem:[#allocation2 + $0x30] sm:$0xff]   ;;  %v2891_v47 = vld [vmem:[#allocation3] sm:$0xff] }
 0x1f2   : > { %v608_v57 = vld [vmem:[%s3294_s16 + $0x20] sm:$0xf]  ;;  %v2133_v18 = vld [vmem:[#allocation2 + $0x38] sm:$0xff]   ;;  %v606_v44 = vld [vmem:[%s3294_s16 + $0x10] sm:$0xff] }
 0x1f3   : > { %631 = vperm.xlu0 %2124, %v608_v57   ;;  %1984 = vmatpush3.bf16.msra.mxu1 %v602_v59  ;;  %v607_v42 = vld [vmem:[%s3294_s16 + $0x18] sm:$0xff]  ;;  %v2889_v45 = vld [vmem:[#allocation3 + $0x10] sm:$0xff]  ;;  %v886_v54 = vld [vmem:[#allocation3 + $0x8] sm:$0xff] }
 0x1f4   : > { %1930 = vmatpush3.bf16.msra.mxu0 %v602_v59  ;;  %v2894_v50 = vld [vmem:[#allocation3 + $0x18] sm:$0xff]  ;;  %v2905_v57 = vld [vmem:[#allocation3 + $0x30] sm:$0xff]  ;;  %v605_v58 = vld [vmem:[%s3294_s16 + $0x8] sm:$0xff] }
 0x1f5   : > { %v889_v62 = vld [vmem:[#allocation3 + $0x20] sm:$0xff]  ;;  %v2917_v63 = vld [vmem:[#allocation3 + $0x50] sm:$0xff] }
 0x1f6   : > { %1940 = vmatmul.mubr.msk.bf16.vlgmr.msra.gmra.mxu1 %vm634_vm5, %v597_v60  ;;  %v604_v60 = vld [vmem:[%s3294_s16] sm:$0xff] }
 0x1f7   : > { %1945 = vmatprep.mubr.msk.bf16.mxu1 %vm759_vm6, %v2126_v61  ;;  %1932 = vmatmul.mubr.msk.bf16.vlgmr.msra.gmra.mxu0 %vm634_vm5, %v595_v0 }
 0x1f8   : > { %1935 = vmatprep.mubr.msk.bf16.mxu0 %vm2440_vm4, %v2439_v53 }
 0x1ff   : > { %1936 = vmatmul.mubr.msk.bf16.gmra.mxu0 %vm634_vm5, %v596_v3 }
 0x26e   : > { %v632_v4 = vpop.permute.xlu0 %631 }
 0x2b6   : > { %v694_v5 = vpop.f32.mrf.mxu1 }
 0x2b7   : > { %v695_v6 = vadd.f32 %v694_v5, %v632_v4  ;;  %v2870_v34 = vpop.f32.mrf.mxu0  ;;  %v892_v4 = vld [vmem:[#allocation3 + $0x38] sm:$0xff] }
 0x2b8   : > { %v1941_v7 = vpop.f32.mrf.mxu1 }
 0x2b9   : > { %v702_v8 = vpack.c.bf16 %v695_v6, %v695_v6  ;;  %v1933_v35 = vpop.f32.mrf.mxu0  ;;  %v2927_v7 = vld [vmem:[#allocation3 + $0x28] sm:$0xff] }
 0x2ba   : > { %v697_v9 = vpop.f32.mrf.mxu1 }
 0x2bb   : > { %v786_v10 = vsel %vm784_vm7, %v702_v8, 0  ;;  %1985 = vmatprep.subr.msk.bf16.mxu1 %vm784_vm7, %v702_v8  ;;  %v2875_v37 = vpop.f32.mrf.mxu0  ;;  %v2931_v9 = vld [vmem:[#allocation3 + $0x60] sm:$0xff] }
 0x2bc   : > { %v1942_v12 = vpop.f32.mrf.mxu1  ;;  %1944 = vmatpush3.bf16.msra.mxu1 %v786_v10 }
 0x2bd   : > { %v1934_v38 = vpop.f32.mrf.mxu0  ;;  %v2934_v12 = vld [vmem:[#allocation3 + $0x40] sm:$0xff] }
 0x2bf   : > { %1946 = vmatmul.mubr.msk.bf16.vlgmr.msra.gmra.mxu1 %vm759_vm6, %v2127_v11  ;;  %v2878_v39 = vpop.f32.mrf.mxu0 }
 0x2c0   : > { %1949 = vmatprep.mubr.msk.bf16.mxu1 %vm759_vm6, %v2128_v13 }
 0x2c1   : > { %v1937_v40 = vpop.f32.mrf.mxu0 }
 0x2c2   : > { %v2947_v40 = vld [vmem:[#allocation3 + $0x48] sm:$0xff] }
 0x2c3   : > { %v2881_v41 = vpop.f32.mrf.mxu0 }
 0x2c5   : > { %v1938_v43 = vpop.f32.mrf.mxu0 }
 0x2c7   : > { %1950 = vmatmul.mubr.msk.bf16.gmra.mxu1 %vm759_vm6, %v2129_v14 }
 0x2c8   : > { %1953 = vmatprep.mubr.msk.bf16.mxu1 %vm759_vm6, %v2130_v15 }
 0x2cf   : > { %1954 = vmatmul.mubr.msk.bf16.gmra.mxu1 %vm759_vm6, %v2131_v16 }
 0x2d0   : > { %1957 = vmatprep.mubr.msk.bf16.mxu1 %vm759_vm6, %v2132_v17 }
 0x2d7   : > { %1958 = vmatmul.mubr.msk.bf16.gmra.mxu1 %vm759_vm6, %v2133_v18  ;;  %v2942_v18 = vld [vmem:[#allocation3 + $0x70] sm:$0xff] }
 0x37f   : > { %v2827_v19 = vpop.f32.mrf.mxu1 }
 0x380   : > { %905 = vmax.xlane.f32.xlu1 %v2827_v19 }
 0x381   : > { %v2830_v20 = vpop.f32.mrf.mxu1 }
 0x382   : > { %901 = vmax.xlane.f32.xlu0 %v2830_v20 }
 0x383   : > { %v2833_v21 = vpop.f32.mrf.mxu1 }
 0x384   : > { %907 = vmax.xlane.f32.xlu1 %v2833_v21 }
 0x385   : > { %v2836_v22 = vpop.f32.mrf.mxu1 }
 0x387   : > { %v2838_v23 = vpop.f32.mrf.mxu1 }
 0x388   : > { %903 = vmax.xlane.f32.xlu1 %v2836_v22 }
 0x389   : > { %v2841_v24 = vpop.f32.mrf.mxu1 }
 0x38b   : > { %v2843_v25 = vpop.f32.mrf.mxu1 }
 0x38c   : > { %913 = vmax.xlane.f32.xlu1 %v2838_v23 }
 0x38d   : > { %v2846_v26 = vpop.f32.mrf.mxu1 }
 0x38f   : > { %v2848_v27 = vpop.f32.mrf.mxu1 }
 0x390   : > { %909 = vmax.xlane.f32.xlu1 %v2841_v24  ;;  %921 = vmax.xlane.f32.xlu0 %v2848_v27 }
 0x391   : > { %v2852_v28 = vpop.f32.mrf.mxu1 }
 0x393   : > { %v2854_v29 = vpop.f32.mrf.mxu1 }
 0x394   : > { %915 = vmax.xlane.f32.xlu1 %v2843_v25 }
 0x395   : > { %v2857_v30 = vpop.f32.mrf.mxu1 }
 0x397   : > { %v2859_v31 = vpop.f32.mrf.mxu1 }
 0x398   : > { %911 = vmax.xlane.f32.xlu1 %v2846_v26 }
 0x399   : > { %v2862_v32 = vpop.f32.mrf.mxu1 }
 0x39a   : > { %925 = vmax.xlane.f32.xlu0 %v2862_v32 }
 0x39b   : > { %v2868_v33 = vpop.f32.mrf.mxu1 }
 0x39c   : > { %917 = vmax.xlane.f32.xlu1 %v2852_v28 }
 0x39d   : > { %v2873_v36 = vpop.f32.mrf.mxu1 }
 0x39e   : > { %929 = vmax.xlane.f32.xlu0 %v2859_v31 }
 0x3a0   : > { %919 = vmax.xlane.f32.xlu1 %v2857_v30 }
 0x3a4   : > { %923 = vmax.xlane.f32.xlu1 %v2854_v29 }
 0x3a8   : > { %927 = vmax.xlane.f32.xlu1 %v2873_v36 }
 0x3ac   : > { %931 = vmax.xlane.f32.xlu1 %v2868_v33 }
 0x3b4   : > { %626 = vperm.xlu0 %2124, %v607_v42  }
 0x3bd   : > { %621 = vperm.xlu1 %2125, %v606_v44  }
 0x409   : > { %v906_v46 = vpop.xlane.xlu1 %905 }
 0x40a   : > { %v935_v48 = vmax.f32 %v2889_v45, %v906_v46 }
 0x40b   : > { %v902_v49 = vpop.xlane.xlu0 %901 }
 0x40c   : > { %1473 = vst.msk [vmem:[#allocation3 + $0x10] sm:$0xff] %vm1205_vm8, %v935_v48  ;;  %v933_v51 = vmax.f32 %v2891_v47, %v902_v49  ;;  %1009 = vperm.xlu1 %2125, %v935_v48   ;;  %v951_v15 = vsub.f32 %v2889_v45, %v935_v48 }
 0x40d   : > { %v908_v52 = vpop.xlane.xlu1 %907 }
 0x40e   : > { %1471 = vst.msk [vmem:[#allocation3] sm:$0xff] %vm1205_vm8, %v933_v51  ;;  %v2900_v53 = vmax.f32 %v2894_v50, %v908_v52  ;;  %999 = vperm.xlu0 %2124, %v933_v51   ;;  %v949_v16 = vsub.f32 %v2891_v47, %v933_v51  ;;  %v969_v44 = vmul.f32 1.442695, %v951_v15  ;;  %v896_v52 = vld [vmem:[#allocation3 + $0x58] sm:$0xff] }
 0x410   : > { %1474 = vst.msk [vmem:[#allocation3 + $0x18] sm:$0xff] %vm1205_vm8, %v2900_v53  ;;  %v965_v45 = vmul.f32 1.442695, %v949_v16  ;;  %v952_v46 = vsub.f32 %v2894_v50, %v2900_v53 }
 0x411   : > { %v904_v55 = vpop.xlane.xlu1 %903 }
 0x412   : > { %v934_v56 = vmax.f32 %v886_v54, %v904_v55  ;;  %1014 = vperm.xlu0 %2124, %v2900_v53  }
 0x414   : > { %1472 = vst.msk [vmem:[#allocation3 + $0x8] sm:$0xff] %vm1205_vm8, %v934_v56  ;;  %1004 = vperm.xlu1 %2125, %v934_v56   ;;  %v950_v10 = vsub.f32 %v886_v54, %v934_v56  ;;  %v971_v54 = vmul.f32 1.442695, %v952_v46 }
 0x415   : > { %v914_v59 = vpop.xlane.xlu1 %913 }
 0x416   : > { %v2915_v61 = vmax.f32 %v2905_v57, %v914_v59  ;;  %616 = vperm.xlu0 %2124, %v605_v58   ;;  %v967_v35 = vmul.f32 1.442695, %v950_v10  ;;  %v898_v59 = vld [vmem:[#allocation3 + $0x68] sm:$0xff] }
 0x418   : > { %1477 = vst.msk [vmem:[#allocation3 + $0x30] sm:$0xff] %vm1205_vm8, %v2915_v61  ;;  %611 = vperm.xlu1 %2125, %v604_v60   ;;  %2134 = vpow2.f32 %v967_v35  ;;  %v955_v50 = vsub.f32 %v2905_v57, %v2915_v61 }
 0x419   : > { %v910_v0 = vpop.xlane.xlu1 %909  ;;  %v922_v1 = vpop.xlane.xlu0 %921  ;;  %2136 = vpow2.f32 %v969_v44 }
 0x41a   : > { %v937_v2 = vmax.f32 %v889_v62, %v910_v0  ;;  %v2922_v3 = vmax.f32 %v2917_v63, %v922_v1  ;;  %2138 = vpow2.f32 %v965_v45 }
 0x41b   : > { %2140 = vpow2.f32 %v971_v54 }
 0x41c   : > { %1475 = vst.msk [vmem:[#allocation3 + $0x20] sm:$0xff] %vm1205_vm8, %v937_v2  ;;  %1019 = vperm.xlu1 %2125, %v937_v2   ;;  %1481 = vst.msk [vmem:[#allocation3 + $0x50] sm:$0xff] %vm1205_vm8, %v2922_v3  ;;  %v953_v48 = vsub.f32 %v889_v62, %v937_v2  ;;  %v959_v60 = vsub.f32 %v2917_v63, %v2922_v3  ;;  %v977_v62 = vmul.f32 1.442695, %v955_v50  ;;  %v2969_v2 = vld [vmem:[#allocation3 + $0x78] sm:$0xff] }
 0x41d   : > { %v916_v5 = vpop.xlane.xlu1 %915 }
 0x41e   : > { %v940_v6 = vmax.f32 %v892_v4, %v916_v5  ;;  %v973_v55 = vmul.f32 1.442695, %v953_v48 }
 0x420   : > { %1478 = vst.msk [vmem:[#allocation3 + $0x38] sm:$0xff] %vm1205_vm8, %v940_v6  ;;  %1029 = vperm.xlu1 %2125, %v2915_v61   ;;  %v956_v56 = vsub.f32 %v892_v4, %v940_v6  ;;  %2142 = vpow2.f32 %v973_v55  ;;  %v985_v4 = vmul.f32 1.442695, %v959_v60 }
 0x421   : > { %v912_v8 = vpop.xlane.xlu1 %911  ;;  %2144 = vpow2.f32 %v977_v62 }
 0x422   : > { %v938_v11 = vmax.f32 %v2927_v7, %v912_v8  ;;  %v979_v57 = vmul.f32 1.442695, %v956_v56 }
 0x423   : > { %v926_v13 = vpop.xlane.xlu0 %925 }
 0x424   : > { %1476 = vst.msk [vmem:[#allocation3 + $0x28] sm:$0xff] %vm1205_vm8, %v938_v11  ;;  %1024 = vperm.xlu0 %2124, %v938_v11   ;;  %v2938_v14 = vmax.f32 %v2931_v9, %v926_v13  ;;  %v954_v0 = vsub.f32 %v2927_v7, %v938_v11  ;;  %2146 = vpow2.f32 %v979_v57 }
 0x425   : > { %v918_v17 = vpop.xlane.xlu1 %917  ;;  %v2977_v8 = vpop.eup %2134  ;;  %2148 = vpow2.f32 %v985_v4 }
 0x426   : > { %v941_v38 = vmax.f32 %v2934_v12, %v918_v17  ;;  %1483 = vst.msk [vmem:[#allocation3 + $0x60] sm:$0xff] %vm1205_vm8, %v2938_v14  ;;  %v975_v63 = vmul.f32 1.442695, %v954_v0  ;;  %v961_v13 = vsub.f32 %v2931_v9, %v2938_v14  ;;  %v2987_v16 = vpop.eup %2136 }
 0x427   : > { %v930_v42 = vpop.xlane.xlu0 %929  ;;  %v2992_v44 = vpop.eup %2138 }
 0x428   : > { %1479 = vst.msk [vmem:[#allocation3 + $0x40] sm:$0xff] %vm1205_vm8, %v941_v38  ;;  %1034 = vperm.xlu0 %2124, %v940_v6   ;;  %1039 = vperm.xlu1 %2125, %v941_v38   ;;  %v2951_v43 = vmax.f32 %v2942_v18, %v930_v42  ;;  %2150 = vpow2.f32 %v975_v63  ;;  %v989_v46 = vmul.f32 1.442695, %v961_v13  ;;  %v2996_v9 = vpop.eup %2140 }
 0x429   : > { %v920_v47 = vpop.xlane.xlu1 %919 }
 0x42a   : > { %v942_v49 = vmax.f32 %v2947_v40, %v920_v47  ;;  %v963_v51 = vsub.f32 %v2942_v18, %v2951_v43  ;;  %1485 = vst.msk [vmem:[#allocation3 + $0x70] sm:$0xff] %vm1205_vm8, %v2951_v43 }
 0x42c   : > { %1480 = vst.msk [vmem:[#allocation3 + $0x48] sm:$0xff] %vm1205_vm8, %v942_v49  ;;  %1044 = vperm.xlu0 %2124, %v942_v49   ;;  %1049 = vperm.xlu1 %2125, %v2922_v3   ;;  %v957_v3 = vsub.f32 %v2934_v12, %v941_v38  ;;  %v958_v17 = vsub.f32 %v2947_v40, %v942_v49 }
 0x42d   : > { %v924_v53 = vpop.xlane.xlu1 %923  ;;  %v2998_v40 = vpop.eup %2142 }
 0x42e   : > { %v944_v58 = vmax.f32 %v896_v52, %v924_v53  ;;  %v981_v12 = vmul.f32 1.442695, %v957_v3 }
 0x42f   : > { %v627_v10 = vpop.permute.xlu0 %626 }
 0x430   : > { %1482 = vst.msk [vmem:[#allocation3 + $0x58] sm:$0xff] %vm1205_vm8, %v944_v58  ;;  %1054 = vperm.xlu0 %2124, %v944_v58   ;;  %1059 = vperm.xlu1 %2125, %v2938_v14   ;;  %v960_v6 = vsub.f32 %v896_v52, %v944_v58  ;;  %v690_v38 = vadd.f32 %v2881_v41, %v627_v10  ;;  %2152 = vpow2.f32 %v981_v12  ;;  %v983_v14 = vmul.f32 1.442695, %v958_v17 }
 0x431   : > { %v928_v1 = vpop.xlane.xlu1 %927 }
 0x432   : > { %v946_v61 = vmax.f32 %v898_v59, %v928_v1  ;;  %v987_v35 = vmul.f32 1.442695, %v960_v6 }
 0x434   : > { %1484 = vst.msk [vmem:[#allocation3 + $0x68] sm:$0xff] %vm1205_vm8, %v946_v61  ;;  %1069 = vperm.xlu1 %2125, %v2951_v43   ;;  %1064 = vperm.xlu0 %2124, %v946_v61   ;;  %2154 = vpow2.f32 %v987_v35  ;;  %v962_v47 = vsub.f32 %v898_v59, %v946_v61 }
 0x435   : > { %v932_v5 = vpop.xlane.xlu1 %931  ;;  %2156 = vpow2.f32 %v989_v46 }
 0x436   : > { %v2975_v7 = vmax.f32 %v2969_v2, %v932_v5  ;;  %2158 = vpow2.f32 %v983_v14  ;;  %v991_v41 = vmul.f32 1.442695, %v962_v47 }
 0x438   : > { %v964_v11 = vsub.f32 %v2969_v2, %v2975_v7  ;;  %1486 = vst.msk [vmem:[#allocation3 + $0x78] sm:$0xff] %vm1205_vm8, %v2975_v7  ;;  %1245 = vperm.xlu1 %2125, %v2977_v8   ;;  %1074 = vperm.xlu0 %2124, %v2975_v7   ;;  %2160 = vpow2.f32 %v991_v41 }
 0x439   : > { %v622_v15 = vpop.permute.xlu1 %621 }
 0x43a   : > { %v687_v42 = vadd.f32 %v2878_v39, %v622_v15  ;;  %v3002_v39 = vpop.eup %2144 }
 0x43b   : > { %v3004_v48 = vpop.eup %2146 }
 0x43c   : > { %v701_v45 = vpack.c.bf16 %v690_v38, %v687_v42  ;;  %1250 = vperm.xlu1 %2125, %v2987_v16   ;;  %1240 = vperm.xlu0 %2124, %v2992_v44   ;;  %v3008_v49 = vpop.eup %2148 }
 0x43d   : > { %v3010_v52 = vpop.eup %2150 }
 0x43e   : > { %1961 = vmatprep.subr.bf16.mxu0 %v701_v45  ;;  %v3014_v54 = vpop.eup %2152 }
 0x43f   : > { %1962 = vmatpush3.bf16.xpose.msra.mxu0 %v701_v45 }
 0x440   : > { %1260 = vperm.xlu1 %2125, %v2998_v40   ;;  %1255 = vperm.xlu0 %2124, %v2996_v9  }
 0x441   : > { %v3016_v50 = vpop.eup %2154 }
 0x442   : > { %v3020_v53 = vpop.eup %2156 }
 0x443   : > { %v3022_v55 = vpop.eup %2158 }
 0x444   : > { %1270 = vperm.xlu1 %2125, %v3002_v39   ;;  %1275 = vperm.xlu0 %2124, %v3004_v48  }
 0x445   : > { %v3026_v56 = vpop.eup %2160 }
 0x448   : > { %1290 = vperm.xlu1 %2125, %v3008_v49   ;;  %1265 = vperm.xlu0 %2124, %v3010_v52  }
 0x44c   : > { %1280 = vperm.xlu1 %2125, %v3014_v54   ;;  %1295 = vperm.xlu0 %2124, %v3016_v50  }
 0x450   : > { %1300 = vperm.xlu1 %2125, %v3020_v53   ;;  %1285 = vperm.xlu0 %2124, %v3022_v55  }
 0x454   : > { %1305 = vperm.xlu0 %2124, %v3026_v56  }
 0x487   : > { %v1010_v58 = vpop.permute.xlu1 %1009 }
 0x488   : > { %v1079_v59 = vsub.f32 %v2827_v19, %v1010_v58 }
 0x489   : > { %v1000_v60 = vpop.permute.xlu0 %999 }
 0x48a   : > { %v1097_v62 = vmul.f32 1.442695, %v1079_v59  ;;  %v1077_v0 = vsub.f32 %v2830_v20, %v1000_v60 }
 0x48c   : > { %2162 = vpow2.f32 %v1097_v62  ;;  %v1093_v1 = vmul.f32 1.442695, %v1077_v0 }
 0x48d   : > { %v1015_v57 = vpop.permute.xlu0 %1014 }
 0x48e   : > { %2164 = vpow2.f32 %v1093_v1  ;;  %v1080_v61 = vsub.f32 %v2833_v21, %v1015_v57 }
 0x48f   : > { %v1005_v4 = vpop.permute.xlu1 %1004 }
 0x490   : > { %v1099_v63 = vmul.f32 1.442695, %v1080_v61  ;;  %v1078_v3 = vsub.f32 %v2836_v22, %v1005_v4 }
 0x491   : > { %v617_v5 = vpop.permute.xlu0 %616 }
 0x492   : > { %2166 = vpow2.f32 %v1099_v63  ;;  %v1095_v6 = vmul.f32 1.442695, %v1078_v3  ;;  %v682_v19 = vadd.f32 %v2875_v37, %v617_v5 }
 0x493   : > { %v612_v10 = vpop.permute.xlu1 %611 }
 0x494   : > { %2168 = vpow2.f32 %v1095_v6  ;;  %v679_v12 = vadd.f32 %v2870_v34, %v612_v10 }
 0x496   : > { %v700_v20 = vpack.c.bf16 %v682_v19, %v679_v12 }
 0x497   : > { %v1020_v13 = vpop.permute.xlu1 %1019 }
 0x498   : > { %1963 = vmatprep.subr.bf16.mxu0 %v700_v20  ;;  %v1081_v17 = vsub.f32 %v2841_v24, %v1020_v13 }
 0x499   : > { %v2163_v15 = vpop.eup %2162  ;;  %1964 = vmatpush3.bf16.xpose.msra.mxu0 %v700_v20 }
 0x49a   : > { %1161 = vadd.xlane.f32.xlu0 %v2163_v15  ;;  %v1101_v45 = vmul.f32 1.442695, %v1081_v17 }
 0x49b   : > { %v2165_v21 = vpop.eup %2164  ;;  %v1030_v35 = vpop.permute.xlu1 %1029 }
 0x49c   : > { %v1083_v22 = vsub.f32 %v2838_v23, %v1030_v35  ;;  %1157 = vadd.xlane.f32.xlu1 %v2165_v21 }
 0x49e   : > { %v1105_v38 = vmul.f32 1.442695, %v1083_v22 }
 0x49f   : > { %v2167_v42 = vpop.eup %2166  ;;  %v1025_v46 = vpop.permute.xlu0 %1024 }
 0x4a0   : > { %2170 = vpow2.f32 %v1105_v38  ;;  %v1082_v34 = vsub.f32 %v2846_v26, %v1025_v46  ;;  %1163 = vadd.xlane.f32.xlu1 %v2167_v42  ;;  %v1335_v24 = vpack.c.bf16 %v2167_v42, %v2163_v15 }
 0x4a1   : > { %v2169_v37 = vpop.eup %2168  ;;  %2172 = vpow2.f32 %v1101_v45 }
 0x4a2   : > { %v1103_v14 = vmul.f32 1.442695, %v1082_v34  ;;  %1159 = vadd.xlane.f32.xlu0 %v2169_v37  ;;  %v1334_v47 = vpack.c.bf16 %v2169_v37, %v2165_v21 }
 0x4a3   : > { %v1035_v41 = vpop.permute.xlu0 %1034  ;;  %v1040_v58 = vpop.permute.xlu1 %1039 }
 0x4a4   : > { %2174 = vpow2.f32 %v1103_v14  ;;  %v1084_v23 = vsub.f32 %v2843_v25, %v1035_v41  ;;  %v1085_v59 = vsub.f32 %v2852_v28, %v1040_v58  ;;  %1965 = vmatprep.mubr.bf16.mxu0 %v1334_v47 }
 0x4a5   : > { %1966 = vmatmul.mubr.bf16.vlgmr.msra.gmra.mxu0 %v1335_v24  ;;  %v993_v24 = vmul.f32 1.442695, %v963_v51 }
 0x4a6   : > { %v1107_v60 = vmul.f32 1.442695, %v1084_v23  ;;  %v1109_v62 = vmul.f32 1.442695, %v1085_v59  ;;  %v995_v23 = vmul.f32 1.442695, %v964_v11 }
 0x4a7   : > { %v1045_v0 = vpop.permute.xlu0 %1044  ;;  %v1050_v26 = vpop.permute.xlu1 %1049 }
 0x4a8   : > { %2176 = vpow2.f32 %v1107_v60  ;;  %v1086_v1 = vsub.f32 %v2857_v30, %v1045_v0  ;;  %v1087_v57 = vsub.f32 %v2848_v27, %v1050_v26 }
 0x4a9   : > { %2178 = vpow2.f32 %v1109_v62 }
 0x4aa   : > { %v1111_v61 = vmul.f32 1.442695, %v1086_v1  ;;  %v1113_v4 = vmul.f32 1.442695, %v1087_v57 }
 0x4ab   : > { %v1055_v63 = vpop.permute.xlu0 %1054  ;;  %v1060_v3 = vpop.permute.xlu1 %1059 }
 0x4ac   : > { %2180 = vpow2.f32 %v1111_v61  ;;  %v1088_v25 = vsub.f32 %v2854_v29, %v1055_v63  ;;  %v1089_v28 = vsub.f32 %v2862_v32, %v1060_v3  ;;  %v1127_v63 = vld [vmem:[#allocation4 + $0x10] sm:$0xff] }
 0x4ad   : > { %v2171_v5 = vpop.eup %2170  ;;  %2182 = vpow2.f32 %v1113_v4 }
 0x4ae   : > { %v1115_v6 = vmul.f32 1.442695, %v1088_v25  ;;  %1169 = vadd.xlane.f32.xlu0 %v2171_v5  ;;  %v1117_v10 = vmul.f32 1.442695, %v1089_v28  ;;  %v2173_v30 = vpop.eup %2172  ;;  %v1125_v25 = vld [vmem:[#allocation4] sm:$0xff]  ;;  %v1143_v28 = vmul.f32 %v2987_v16, %v1127_v63  ;;  %v1134_v63 = vld [vmem:[#allocation4 + $0x48] sm:$0xff] }
 0x4af   : > { %v1065_v19 = vpop.permute.xlu0 %1064  ;;  %v1070_v12 = vpop.permute.xlu1 %1069 }
 0x4b0   : > { %2184 = vpow2.f32 %v1115_v6  ;;  %v1090_v27 = vsub.f32 %v2873_v36, %v1065_v19  ;;  %v1091_v20 = vsub.f32 %v2859_v31, %v1070_v12  ;;  %v1128_v12 = vld [vmem:[#allocation4 + $0x18] sm:$0xff] }
 0x4b1   : > { %v2175_v13 = vpop.eup %2174  ;;  %2186 = vpow2.f32 %v1117_v10  ;;  %v1141_v10 = vmul.f32 %v2992_v44, %v1125_v25  ;;  %v1131_v44 = vld [vmem:[#allocation4 + $0x30] sm:$0xff] }
 0x4b2   : > { %v1119_v15 = vmul.f32 1.442695, %v1090_v27  ;;  %v1121_v21 = vmul.f32 1.442695, %v1091_v20  ;;  %1165 = vadd.xlane.f32.xlu0 %v2173_v30  ;;  %v1336_v29 = vpack.c.bf16 %v2175_v13, %v2173_v30  ;;  %v1126_v27 = vld [vmem:[#allocation4 + $0x8] sm:$0xff]  ;;  %v1144_v20 = vmul.f32 %v2996_v9, %v1128_v12 }
 0x4b3   : > { %v1075_v32 = vpop.permute.xlu0 %1074  ;;  %v3061_v0 = vpop.permute.xlu1 %1245 }
 0x4b4   : > { %2188 = vpow2.f32 %v1119_v15  ;;  %v1092_v17 = vsub.f32 %v2868_v33, %v1075_v32  ;;  %1969 = vmatprep.mubr.bf16.mxu0 %v1336_v29  ;;  %v1147_v32 = vmul.f32 %v3002_v39, %v1131_v44 }
 0x4b5   : > { %v2177_v35 = vpop.eup %2176  ;;  %2190 = vpow2.f32 %v1121_v21  ;;  %v1142_v21 = vmul.f32 %v2977_v8, %v1126_v27 }
 0x4b6   : > { %v1123_v22 = vmul.f32 1.442695, %v1092_v17  ;;  %1171 = vadd.xlane.f32.xlu1 %v2177_v35  ;;  %v1337_v38 = vpack.c.bf16 %v2177_v35, %v2171_v5  ;;  %v2179_v42 = vpop.eup %2178  ;;  %v1129_v35 = vld [vmem:[#allocation4 + $0x20] sm:$0xff] }
 0x4b7   : > { %v3059_v62 = vpop.permute.xlu0 %1240  ;;  %v3065_v43 = vpop.permute.xlu1 %1250  ;;  %v1145_v9 = vmul.f32 %v2998_v40, %v1129_v35 }
 0x4b8   : > { %2192 = vpow2.f32 %v1123_v22  ;;  %1970 = vmatmul.mubr.bf16.gmra.mxu0 %v1337_v38 }
 0x4b9   : > { %v2181_v31 = vpop.eup %2180  ;;  %2194 = vpow2.f32 %v993_v24 }
 0x4ba   : > { %v2183_v36 = vpop.eup %2182  ;;  %1167 = vadd.xlane.f32.xlu1 %v2175_v13  ;;  %v1338_v45 = vpack.c.bf16 %v2181_v31, %v2179_v42  ;;  %2196 = vpow2.f32 %v995_v23 }
 0x4bb   : > { %1177 = vadd.xlane.f32.xlu0 %v2183_v36  ;;  %v3063_v18 = vpop.permute.xlu0 %1255  ;;  %v3069_v2 = vpop.permute.xlu1 %1260 }
 0x4bc   : > { %1973 = vmatprep.mubr.bf16.mxu0 %v1338_v45  ;;  %v1130_v45 = vld [vmem:[#allocation4 + $0x28] sm:$0xff] }
 0x4bd   : > { %v2185_v46 = vpop.eup %2184  ;;  %v1146_v39 = vmul.f32 %v3010_v52, %v1130_v45 }
 0x4be   : > { %1179 = vadd.xlane.f32.xlu1 %v2185_v46  ;;  %v1339_v34 = vpack.c.bf16 %v2185_v46, %v2183_v36  ;;  %v2187_v33 = vpop.eup %2186 }
 0x4bf   : > { %1173 = vadd.xlane.f32.xlu0 %v2179_v42  ;;  %v3067_v51 = vpop.permute.xlu0 %1275  ;;  %v3073_v11 = vpop.permute.xlu1 %1270  ;;  %v1132_v42 = vld [vmem:[#allocation4 + $0x38] sm:$0xff] }
 0x4c0   : > { %1974 = vmatmul.mubr.bf16.gmra.mxu0 %v1339_v34  ;;  %v1148_v8 = vmul.f32 %v3004_v48, %v1132_v42  ;;  %v1135_v34 = vld [vmem:[#allocation4 + $0x50] sm:$0xff] }
 0x4c1   : > { %v2189_v37 = vpop.eup %2188 }
 0x4c2   : > { %v2191_v14 = vpop.eup %2190  ;;  %1175 = vadd.xlane.f32.xlu1 %v2181_v31  ;;  %v1340_v47 = vpack.c.bf16 %v2189_v37, %v2187_v33 }
 0x4c3   : > { %1185 = vadd.xlane.f32.xlu0 %v2191_v14  ;;  %v3071_v7 = vpop.permute.xlu0 %1265  ;;  %v3077_v1 = vpop.permute.xlu1 %1290 }
 0x4c4   : > { %1977 = vmatprep.mubr.bf16.mxu0 %v1340_v47 }
 0x4c5   : > { %v2193_v41 = vpop.eup %2192 }
 0x4c6   : > { %1187 = vadd.xlane.f32.xlu1 %v2193_v41  ;;  %v1341_v58 = vpack.c.bf16 %v2193_v41, %v2191_v14  ;;  %v3053_v59 = vpop.eup %2194  ;;  %v1136_v14 = vld [vmem:[#allocation4 + $0x58] sm:$0xff]  ;;  %v1133_v41 = vld [vmem:[#allocation4 + $0x40] sm:$0xff] }
 0x4c7   : > { %1181 = vadd.xlane.f32.xlu0 %v2187_v33  ;;  %v3056_v60 = vpop.eup %2196  ;;  %v3075_v26 = vpop.permute.xlu0 %1295  ;;  %v1151_v33 = vmul.f32 %v3008_v49, %v1135_v34  ;;  %v1152_v48 = vmul.f32 %v3016_v50, %v1136_v14  ;;  %v1149_v24 = vmul.f32 %v3014_v54, %v1133_v41  ;;  %v1140_v50 = vld [vmem:[#allocation4 + $0x78] sm:$0xff]  ;;  %v1226_v34 = vld [vmem:[#allocation5 + $0x20] sm:$0xff] }
 0x4c8   : > { %1978 = vmatmul.mubr.bf16.gmra.mxu0 %v1341_v58  ;;  %v3081_v61 = vpop.permute.xlu1 %1280  ;;  %v1156_v27 = vmul.f32 %v3056_v60, %v1140_v50  ;;  %v1236_v50 = vld [vmem:[#allocation5 + $0x70] sm:$0xff] }
 0x4ca   : > { %1183 = vadd.xlane.f32.xlu1 %v2189_v37 }
 0x4cb   : > { %v3079_v57 = vpop.permute.xlu0 %1285 }
 0x4cc   : > { %v3085_v3 = vpop.permute.xlu1 %1300 }
 0x4cf   : > { %v3083_v4 = vpop.permute.xlu0 %1305 }
 0x4db   : > { %1310 = vperm.xlu1 %2125, %v3053_v59  }
 0x4dd   : > { %1315 = vperm.xlu0 %2124, %v3056_v60   ;;  %v1224_v60 = vld [vmem:[#allocation5 + $0x10] sm:$0xff] }
 0x523   : > { %v1162_v5 = vpop.xlane.xlu0 %1161 }
 0x524   : > { %v1191_v6 = vadd.f32 %v1162_v5, %v1143_v28  ;;  %v1139_v28 = vld [vmem:[#allocation4 + $0x70] sm:$0xff]  ;;  %v1150_v5 = vmul.f32 %v3022_v55, %v1134_v63  ;;  %v1138_v55 = vld [vmem:[#allocation4 + $0x68] sm:$0xff] }
 0x525   : > { %v1158_v19 = vpop.xlane.xlu1 %1157 }
 0x526   : > { %1208 = vst.msk [vmem:[#allocation4 + $0x10] sm:$0xff] %vm1205_vm8, %v1191_v6  ;;  %v1189_v30 = vadd.f32 %v1158_v19, %v1141_v10  ;;  %v1155_v6 = vmul.f32 %v3053_v59, %v1139_v28  ;;  %v1154_v59 = vmul.f32 %v3026_v56, %v1138_v55 }
 0x528   : > { %1206 = vst.msk [vmem:[#allocation4] sm:$0xff] %vm1205_vm8, %v1189_v30  ;;  %v1137_v30 = vld [vmem:[#allocation4 + $0x60] sm:$0xff] }
 0x529   : > { %v1164_v13 = vpop.xlane.xlu1 %1163 }
 0x52a   : > { %v1192_v15 = vadd.f32 %v1164_v13, %v1144_v20  ;;  %v1153_v20 = vmul.f32 %v3020_v53, %v1137_v30  ;;  %v1225_v53 = vld [vmem:[#allocation5 + $0x18] sm:$0xff] }
 0x52b   : > { %v1160_v29 = vpop.xlane.xlu0 %1159 }
 0x52c   : > { %1209 = vst.msk [vmem:[#allocation4 + $0x18] sm:$0xff] %vm1205_vm8, %v1192_v15  ;;  %v1190_v16 = vadd.f32 %v1160_v29, %v1142_v21 }
 0x52e   : > { %1207 = vst.msk [vmem:[#allocation4 + $0x8] sm:$0xff] %vm1205_vm8, %v1190_v16 }
 0x537   : > { %v1170_v17 = vpop.xlane.xlu0 %1169 }
 0x538   : > { %v1195_v22 = vadd.f32 %v1170_v17, %v1147_v32  ;;  %v1222_v32 = vld [vmem:[#allocation5] sm:$0xff]  ;;  %v1320_v17 = vmul.f32 %v3065_v43, %v1224_v60 }
 0x53a   : > { %1212 = vst.msk [vmem:[#allocation4 + $0x30] sm:$0xff] %vm1205_vm8, %v1195_v22  ;;  %v1318_v22 = vmul.f32 %v3059_v62, %v1222_v32  ;;  %v1228_v62 = vld [vmem:[#allocation5 + $0x30] sm:$0xff] }
 0x53b   : > { %v1166_v38 = vpop.xlane.xlu0 %1165 }
 0x53c   : > { %v1193_v31 = vadd.f32 %v1166_v38, %v1145_v9  ;;  %v1223_v38 = vld [vmem:[#allocation5 + $0x8] sm:$0xff] }
 0x53e   : > { %1210 = vst.msk [vmem:[#allocation4 + $0x20] sm:$0xff] %vm1205_vm8, %v1193_v31  ;;  %v1321_v31 = vmul.f32 %v3063_v18, %v1225_v53  ;;  %v1229_v18 = vld [vmem:[#allocation5 + $0x38] sm:$0xff] }
 0x53f   : > { %v1172_v36 = vpop.xlane.xlu1 %1171 }
 0x540   : > { %v1196_v46 = vadd.f32 %v1172_v36, %v1148_v8  ;;  %v1319_v36 = vmul.f32 %v3061_v0, %v1223_v38 }
 0x542   : > { %1213 = vst.msk [vmem:[#allocation4 + $0x38] sm:$0xff] %vm1205_vm8, %v1196_v46 }
 0x543   : > { %v1168_v37 = vpop.xlane.xlu1 %1167 }
 0x544   : > { %v1178_v40 = vpop.xlane.xlu0 %1177  ;;  %v1194_v47 = vadd.f32 %v1168_v37, %v1146_v39  ;;  %v1324_v39 = vmul.f32 %v3073_v11, %v1228_v62  ;;  %v1322_v37 = vmul.f32 %v3069_v2, %v1226_v34  ;;  %v1230_v11 = vld [vmem:[#allocation5 + $0x40] sm:$0xff] }
 0x545   : > { %v1199_v58 = vadd.f32 %v1178_v40, %v1151_v33  ;;  %v1227_v40 = vld [vmem:[#allocation5 + $0x28] sm:$0xff] }
 0x546   : > { %1211 = vst.msk [vmem:[#allocation4 + $0x28] sm:$0xff] %vm1205_vm8, %v1194_v47  ;;  %v1325_v47 = vmul.f32 %v3067_v51, %v1229_v18  ;;  %v1326_v51 = vmul.f32 %v3081_v61, %v1230_v11 }
 0x547   : > { %1216 = vst.msk [vmem:[#allocation4 + $0x50] sm:$0xff] %vm1205_vm8, %v1199_v58  ;;  %v1180_v23 = vpop.xlane.xlu1 %1179  ;;  %v1232_v58 = vld [vmem:[#allocation5 + $0x50] sm:$0xff] }
 0x548   : > { %v1174_v25 = vpop.xlane.xlu0 %1173  ;;  %v1200_v52 = vadd.f32 %v1180_v23, %v1152_v48 }
 0x549   : > { %v1197_v49 = vadd.f32 %v1174_v25, %v1149_v24  ;;  %v1323_v24 = vmul.f32 %v3071_v7, %v1227_v40  ;;  %v1328_v25 = vmul.f32 %v3077_v1, %v1232_v58 }
 0x54a   : > { %1217 = vst.msk [vmem:[#allocation4 + $0x58] sm:$0xff] %vm1205_vm8, %v1200_v52  ;;  %v1233_v52 = vld [vmem:[#allocation5 + $0x58] sm:$0xff] }
 0x54b   : > { %1214 = vst.msk [vmem:[#allocation4 + $0x40] sm:$0xff] %vm1205_vm8, %v1197_v49  ;;  %v1176_v10 = vpop.xlane.xlu1 %1175  ;;  %v1329_v7 = vmul.f32 %v3075_v26, %v1233_v52 }
 0x54c   : > { %v1186_v19 = vpop.xlane.xlu0 %1185  ;;  %v1198_v12 = vadd.f32 %v1176_v10, %v1150_v5  ;;  %v1231_v5 = vld [vmem:[#allocation5 + $0x48] sm:$0xff] }
 0x54d   : > { %v1203_v54 = vadd.f32 %v1186_v19, %v1155_v6 }
 0x54e   : > { %1215 = vst.msk [vmem:[#allocation4 + $0x48] sm:$0xff] %vm1205_vm8, %v1198_v12  ;;  %v1327_v12 = vmul.f32 %v3079_v57, %v1231_v5 }
 0x54f   : > { %1220 = vst.msk [vmem:[#allocation4 + $0x70] sm:$0xff] %vm1205_vm8, %v1203_v54  ;;  %v1188_v13 = vpop.xlane.xlu1 %1187  ;;  %v1234_v54 = vld [vmem:[#allocation5 + $0x60] sm:$0xff] }
 0x550   : > { %v1182_v15 = vpop.xlane.xlu0 %1181  ;;  %v1204_v21 = vadd.f32 %v1188_v13, %v1156_v27  ;;  %v1237_v13 = vld [vmem:[#allocation5 + $0x78] sm:$0xff] }
 0x551   : > { %v1201_v29 = vadd.f32 %v1182_v15, %v1153_v20  ;;  %v1330_v15 = vmul.f32 %v3085_v3, %v1234_v54 }
 0x552   : > { %1221 = vst.msk [vmem:[#allocation4 + $0x78] sm:$0xff] %vm1205_vm8, %v1204_v21 }
 0x553   : > { %1218 = vst.msk [vmem:[#allocation4 + $0x60] sm:$0xff] %vm1205_vm8, %v1201_v29  ;;  %v1184_v16 = vpop.xlane.xlu1 %1183  ;;  %v1235_v29 = vld [vmem:[#allocation5 + $0x68] sm:$0xff] }
 0x554   : > { %v1202_v44 = vadd.f32 %v1184_v16, %v1154_v59  ;;  %v1331_v60 = vmul.f32 %v3083_v4, %v1235_v29 }
 0x556   : > { %1219 = vst.msk [vmem:[#allocation4 + $0x68] sm:$0xff] %vm1205_vm8, %v1202_v44 }
 0x557   : > { %v1311_v19 = vpop.permute.xlu1 %1310 }
 0x558   : > { %v1332_v27 = vmul.f32 %v1311_v19, %v1236_v50  ;;  %v1316_v55 = vpop.permute.xlu0 %1315 }
 0x559   : > { %v1333_v57 = vmul.f32 %v1316_v55, %v1237_v13 }
 0x565   : > { %v1967_v35 = vpop.f32.mrf.mxu0 }
 0x566   : > { %v1441_v9 = vadd.f32 %v1967_v35, %v1320_v17 }
 0x567   : > { %v1376_v42 = vpop.f32.mrf.mxu0 }
 0x568   : > { %1457 = vst.msk [vmem:[#allocation5 + $0x10] sm:$0xff] %vm634_vm5, %v1441_v9  ;;  %v1439_v56 = vadd.f32 %v1376_v42, %v1318_v22 }
 0x569   : > { %v1968_v8 = vpop.f32.mrf.mxu0 }
 0x56a   : > { %1455 = vst.msk [vmem:[#allocation5] sm:$0xff] %vm634_vm5, %v1439_v56  ;;  %v1442_v45 = vadd.f32 %v1968_v8, %v1321_v31 }
 0x56b   : > { %v1379_v46 = vpop.f32.mrf.mxu0 }
 0x56c   : > { %1458 = vst.msk [vmem:[#allocation5 + $0x18] sm:$0xff] %vm634_vm5, %v1442_v45  ;;  %v1440_v43 = vadd.f32 %v1379_v46, %v1319_v36 }
 0x56e   : > { %1456 = vst.msk [vmem:[#allocation5 + $0x8] sm:$0xff] %vm634_vm5, %v1440_v43 }
 0x578   : > { %v1971_v33 = vpop.f32.mrf.mxu0 }
 0x579   : > { %v1445_v14 = vadd.f32 %v1971_v33, %v1324_v39 }
 0x57a   : > { %v1392_v0 = vpop.f32.mrf.mxu0 }
 0x57b   : > { %1461 = vst.msk [vmem:[#allocation5 + $0x30] sm:$0xff] %vm634_vm5, %v1445_v14  ;;  %v1443_v41 = vadd.f32 %v1392_v0, %v1322_v37 }
 0x57c   : > { %v1972_v48 = vpop.f32.mrf.mxu0 }
 0x57d   : > { %1459 = vst.msk [vmem:[#allocation5 + $0x20] sm:$0xff] %vm634_vm5, %v1443_v41  ;;  %v1446_v23 = vadd.f32 %v1972_v48, %v1325_v47 }
 0x57e   : > { %v1395_v63 = vpop.f32.mrf.mxu0 }
 0x57f   : > { %1462 = vst.msk [vmem:[#allocation5 + $0x38] sm:$0xff] %vm634_vm5, %v1446_v23  ;;  %v1444_v2 = vadd.f32 %v1395_v63, %v1323_v24 }
 0x580   : > { %v1975_v28 = vpop.f32.mrf.mxu0 }
 0x581   : > { %1460 = vst.msk [vmem:[#allocation5 + $0x28] sm:$0xff] %vm634_vm5, %v1444_v2  ;;  %v1449_v49 = vadd.f32 %v1975_v28, %v1328_v25 }
 0x582   : > { %v1408_v6 = vpop.f32.mrf.mxu0 }
 0x583   : > { %1465 = vst.msk [vmem:[#allocation5 + $0x50] sm:$0xff] %vm634_vm5, %v1449_v49  ;;  %v1447_v10 = vadd.f32 %v1408_v6, %v1326_v51 }
 0x584   : > { %v1976_v1 = vpop.f32.mrf.mxu0 }
 0x585   : > { %1463 = vst.msk [vmem:[#allocation5 + $0x40] sm:$0xff] %vm634_vm5, %v1447_v10  ;;  %v1450_v30 = vadd.f32 %v1976_v1, %v1329_v7 }
 0x586   : > { %v1411_v61 = vpop.f32.mrf.mxu0 }
 0x587   : > { %1466 = vst.msk [vmem:[#allocation5 + $0x58] sm:$0xff] %vm634_vm5, %v1450_v30  ;;  %v1448_v20 = vadd.f32 %v1411_v61, %v1327_v12 }
 0x588   : > { %v1979_v26 = vpop.f32.mrf.mxu0 }
 0x589   : > { %1464 = vst.msk [vmem:[#allocation5 + $0x48] sm:$0xff] %vm634_vm5, %v1448_v20  ;;  %v1453_v21 = vadd.f32 %v1979_v26, %v1332_v27 }
 0x58a   : > { %v1424_v59 = vpop.f32.mrf.mxu0 }
 0x58b   : > { %1469 = vst.msk [vmem:[#allocation5 + $0x70] sm:$0xff] %vm634_vm5, %v1453_v21  ;;  %v1451_v16 = vadd.f32 %v1424_v59, %v1330_v15 }
 0x58c   : > { %v1980_v44 = vpop.f32.mrf.mxu0 }
 0x58d   : > { %1467 = vst.msk [vmem:[#allocation5 + $0x60] sm:$0xff] %vm634_vm5, %v1451_v16  ;;  %v1454_v32 = vadd.f32 %v1980_v44, %v1333_v57  ;;  %1490 = sbr.rel (%p1870_p7) target bundleno = 1710 (0x6ae), region = 64 }
 0x58e   : > { %v1427_v17 = vpop.f32.mrf.mxu0 }
 0x58f   : > { %1470 = vst.msk [vmem:[#allocation5 + $0x78] sm:$0xff] %vm634_vm5, %v1454_v32  ;;  %v1452_v53 = vadd.f32 %v1427_v17, %v1331_v60 }
 0x591   : > { %1468 = vst.msk [vmem:[#allocation5 + $0x68] sm:$0xff] %vm634_vm5, %v1452_v53 }
 0x592   : > { %v1493_v3 = vld [vmem:[#allocation4 + $0x10] sm:$0xff]  ;;  %v1491_v35 = vld [vmem:[#allocation4] sm:$0xff]  ;;  %v1494_v22 = vld [vmem:[#allocation4 + $0x18] sm:$0xff]  ;;  %v2442_v9 = vmov 0  }
 0x593   : > { %2199 = vset.pattern.permute.xlu1 %v2442_v9  ;;  %2198 = vset.pattern.permute.xlu0 %v2442_v9  ;;  %2200 = vrcp.f32 %v1493_v3  ;;  %v1492_v4 = vld [vmem:[#allocation4 + $0x8] sm:$0xff]  ;;  %v1495_v42 = vld [vmem:[#allocation4 + $0x20] sm:$0xff]  ;;  %v1498_v31 = vld [vmem:[#allocation4 + $0x38] sm:$0xff] }
 0x594   : > { %2202 = vrcp.f32 %v1491_v35  ;;  %v1496_v38 = vld [vmem:[#allocation4 + $0x28] sm:$0xff]  ;;  %v1497_v56 = vld [vmem:[#allocation4 + $0x30] sm:$0xff]  ;;  %v1499_v36 = vld [vmem:[#allocation4 + $0x40] sm:$0xff] }
 0x595   : > { %2204 = vrcp.f32 %v1494_v22  ;;  %v1500_v8 = vld [vmem:[#allocation4 + $0x48] sm:$0xff]  ;;  %v1502_v62 = vld [vmem:[#allocation4 + $0x58] sm:$0xff]  ;;  %v1501_v39 = vld [vmem:[#allocation4 + $0x50] sm:$0xff] }
 0x596   : > { %2206 = vrcp.f32 %v1492_v4  ;;  %v1504_v33 = vld [vmem:[#allocation4 + $0x68] sm:$0xff]  ;;  %v1503_v14 = vld [vmem:[#allocation4 + $0x60] sm:$0xff]  ;;  %v1506_v0 = vld [vmem:[#allocation4 + $0x78] sm:$0xff] }
 0x597   : > { %2208 = vrcp.f32 %v1496_v38  ;;  %v1505_v41 = vld [vmem:[#allocation4 + $0x70] sm:$0xff]  ;;  %v1523_v52 = vld [vmem:[#allocation5] sm:$0xff]  ;;  %v1524_v49 = vld [vmem:[#allocation5 + $0x8] sm:$0xff] }
 0x598   : > { %2210 = vrcp.f32 %v1495_v42  ;;  %v1525_v5 = vld [vmem:[#allocation5 + $0x10] sm:$0xff]  ;;  %v1526_v19 = vld [vmem:[#allocation5 + $0x18] sm:$0xff]  ;;  %v1527_v30 = vld [vmem:[#allocation5 + $0x20] sm:$0xff] }
 0x599   : > { %2212 = vrcp.f32 %v1498_v31  ;;  %v1528_v27 = vld [vmem:[#allocation5 + $0x28] sm:$0xff]  ;;  %v1529_v55 = vld [vmem:[#allocation5 + $0x30] sm:$0xff]  ;;  %v1530_v21 = vld [vmem:[#allocation5 + $0x38] sm:$0xff] }
 0x59a   : > { %2214 = vrcp.f32 %v1497_v56  ;;  %v1531_v57 = vld [vmem:[#allocation5 + $0x40] sm:$0xff]  ;;  %v1532_v60 = vld [vmem:[#allocation5 + $0x48] sm:$0xff]  ;;  %v1533_v53 = vld [vmem:[#allocation5 + $0x50] sm:$0xff] }
 0x59b   : > { %2216 = vrcp.f32 %v1500_v8  ;;  %v1534_v22 = vld [vmem:[#allocation5 + $0x58] sm:$0xff]  ;;  %v1535_v38 = vld [vmem:[#allocation5 + $0x60] sm:$0xff]  ;;  %v1536_v56 = vld [vmem:[#allocation5 + $0x68] sm:$0xff] }
 0x59c   : > { %2218 = vrcp.f32 %v1499_v36 }
 0x59d   : > { %2220 = vrcp.f32 %v1502_v62  ;;  %v1538_v62 = vld [vmem:[#allocation5 + $0x78] sm:$0xff] }
 0x59e   : > { %2222 = vrcp.f32 %v1501_v39 }
 0x59f   : > { %2224 = vrcp.f32 %v1504_v33  ;;  %v1673_v33 = vld [vmem:[%s2697_s0] sm:$0xff] }
 0x5a0   : > { %v2201_v45 = vpop.eup %2200  ;;  %2226 = vrcp.f32 %v1503_v14 }
 0x5a1   : > { %v2203_v46 = vpop.eup %2202  ;;  %1551 = vperm.xlu1 %2199, %v2201_v45   ;;  %2228 = vrcp.f32 %v1506_v0  ;;  %v1537_v45 = vld [vmem:[#allocation5 + $0x70] sm:$0xff]  ;;  %v1674_v0 = vld [vmem:[%s2697_s0 + $0x8] sm:$0xff] }
 0x5a2   : > { %v2205_v43 = vpop.eup %2204  ;;  %1541 = vperm.xlu0 %2198, %v2203_v46   ;;  %2230 = vrcp.f32 %v1505_v41 }
 0x5a3   : > { %v2207_v34 = vpop.eup %2206 }
 0x5a4   : > { %v2209_v18 = vpop.eup %2208 }
 0x5a5   : > { %1556 = vperm.xlu1 %2199, %v2205_v43   ;;  %v2211_v37 = vpop.eup %2210 }
 0x5a6   : > { %1546 = vperm.xlu0 %2198, %v2207_v34   ;;  %v2213_v40 = vpop.eup %2212 }
 0x5a7   : > { %v2215_v47 = vpop.eup %2214 }
 0x5a8   : > { %v2217_v58 = vpop.eup %2216 }
 0x5a9   : > { %1566 = vperm.xlu1 %2199, %v2209_v18   ;;  %v2219_v48 = vpop.eup %2218  ;;  %v1668_v18 = vstv %s1667_s9 }
 0x5aa   : > { %1561 = vperm.xlu0 %2198, %v2211_v37   ;;  %v2221_v24 = vpop.eup %2220 }
 0x5ab   : > { %v2223_v23 = vpop.eup %2222 }
 0x5ac   : > { %v2225_v11 = vpop.eup %2224 }
 0x5ad   : > { %1576 = vperm.xlu1 %2199, %v2213_v40   ;;  %v2227_v63 = vpop.eup %2226 }
 0x5ae   : > { %1571 = vperm.xlu0 %2198, %v2215_v47   ;;  %v2229_v25 = vpop.eup %2228 }
 0x5af   : > { %v2231_v2 = vpop.eup %2230 }
 0x5b1   : > { %1586 = vperm.xlu1 %2199, %v2217_v58  }
 0x5b2   : > { %1581 = vperm.xlu0 %2198, %v2219_v48   ;;  %v1675_v48 = vld [vmem:[%s2697_s0 + $0x10] sm:$0xff] }
 0x5b5   : > { %1596 = vperm.xlu1 %2199, %v2221_v24  }
 0x5b6   : > { %1591 = vperm.xlu0 %2198, %v2223_v23  }
 0x5b9   : > { %1606 = vperm.xlu1 %2199, %v2225_v11  }
 0x5ba   : > { %1601 = vperm.xlu0 %2198, %v2227_v63   ;;  %v1676_v63 = vld [vmem:[%s2697_s0 + $0x18] sm:$0xff] }
 0x5bd   : > { %1616 = vperm.xlu1 %2199, %v2229_v25  }
 0x5be   : > { %1611 = vperm.xlu0 %2198, %v2231_v2  }
 0x61c   : > { %v1552_v10 = vpop.permute.xlu1 %1551 }
 0x61d   : > { %v1542_v28 = vpop.permute.xlu0 %1541  ;;  %v1621_v50 = vmul.f32 %v1552_v10, %v1525_v5 }
 0x61e   : > { %v1619_v51 = vmul.f32 %v1542_v28, %v1523_v52 }
 0x620   : > { %1635 = vxpose.xlu0.b32.start [1/16] (narrow) %v1619_v51, 32  ;;  %v1557_v1 = vpop.permute.xlu1 %1556 }
 0x621   : > { %v1547_v6 = vpop.permute.xlu0 %1546  ;;  %v1622_v12 = vmul.f32 %v1557_v1, %v1526_v19 }
 0x622   : > { %v1620_v7 = vmul.f32 %v1547_v6, %v1524_v49 }
 0x624   : > { %1636 = vxpose.xlu0.b32.cont [2/16] (narrow) %v1620_v7, 32  ;;  %v1567_v20 = vpop.permute.xlu1 %1566 }
 0x625   : > { %v1562_v54 = vpop.permute.xlu0 %1561  ;;  %v1624_v13 = vmul.f32 %v1567_v20, %v1528_v27 }
 0x626   : > { %v1623_v61 = vmul.f32 %v1562_v54, %v1527_v30 }
 0x628   : > { %1637 = vxpose.xlu0.b32.cont [3/16] (narrow) %v1621_v50, 32  ;;  %v1577_v29 = vpop.permute.xlu1 %1576 }
 0x629   : > { %v1572_v26 = vpop.permute.xlu0 %1571  ;;  %v1626_v59 = vmul.f32 %v1577_v29, %v1530_v21 }
 0x62a   : > { %v1625_v15 = vmul.f32 %v1572_v26, %v1529_v55 }
 0x62c   : > { %1638 = vxpose.xlu0.b32.cont [4/16] (narrow) %v1622_v12, 32  ;;  %v1587_v32 = vpop.permute.xlu1 %1586 }
 0x62d   : > { %v1582_v16 = vpop.permute.xlu0 %1581  ;;  %v1628_v17 = vmul.f32 %v1587_v32, %v1532_v60 }
 0x62e   : > { %v1627_v44 = vmul.f32 %v1582_v16, %v1531_v57 }
 0x630   : > { %1639 = vxpose.xlu0.b32.cont [5/16] (narrow) %v1623_v61, 32  ;;  %v1597_v9 = vpop.permute.xlu1 %1596 }
 0x631   : > { %v1592_v3 = vpop.permute.xlu0 %1591  ;;  %v1630_v4 = vmul.f32 %v1597_v9, %v1534_v22 }
 0x632   : > { %v1629_v35 = vmul.f32 %v1592_v3, %v1533_v53 }
 0x634   : > { %1640 = vxpose.xlu0.b32.cont [6/16] (narrow) %v1624_v13, 32  ;;  %v1607_v8 = vpop.permute.xlu1 %1606 }
 0x635   : > { %v1602_v42 = vpop.permute.xlu0 %1601  ;;  %v1632_v36 = vmul.f32 %v1607_v8, %v1536_v56 }
 0x636   : > { %v1631_v31 = vmul.f32 %v1602_v42, %v1535_v38 }
 0x638   : > { %1641 = vxpose.xlu0.b32.cont [7/16] (narrow) %v1625_v15, 32  ;;  %v1617_v34 = vpop.permute.xlu1 %1616 }
 0x639   : > { %v1612_v46 = vpop.permute.xlu0 %1611  ;;  %v1634_v39 = vmul.f32 %v1617_v34, %v1538_v62 }
 0x63a   : > { %v1633_v43 = vmul.f32 %v1612_v46, %v1537_v45 }
 0x63c   : > { %1642 = vxpose.xlu0.b32.cont [8/16] (narrow) %v1626_v59, 32 }
 0x640   : > { %1643 = vxpose.xlu0.b32.cont [9/16] (narrow) %v1627_v44, 32 }
 0x644   : > { %1644 = vxpose.xlu0.b32.cont [10/16] (narrow) %v1628_v17, 32 }
 0x648   : > { %1645 = vxpose.xlu0.b32.cont [11/16] (narrow) %v1629_v35, 32 }
 0x64c   : > { %1646 = vxpose.xlu0.b32.cont [12/16] (narrow) %v1630_v4, 32 }
 0x650   : > { %1647 = vxpose.xlu0.b32.cont [13/16] (narrow) %v1631_v31, 32 }
 0x654   : > { %1648 = vxpose.xlu0.b32.cont [14/16] (narrow) %v1632_v36, 32 }
 0x658   : > { %1649 = vxpose.xlu0.b32.cont [15/16] (narrow) %v1633_v43, 32 }
 0x65c   : > { %1650 = vxpose.xlu0.b32.end [16/16] (narrow) %v1634_v39, 32 }
 0x69c   : > { %v1651_v37 = vpop.trf.xlu0 }
 0x69d   : > { %v1669_v14 = vmul.f32 %v1668_v18, %v1651_v37 }
 0x69f   : > { %v1677_v40 = vadd.f32 %v1673_v33, %v1669_v14 }
 0x6a0   : > { %v1652_v47 = vpop.trf.xlu0 }
 0x6a1   : > { %1681 = vst [vmem:[%s2710_s19] sm:$0xff] %v1677_v40  ;;  %v1670_v41 = vmul.f32 %v1668_v18, %v1652_v47 }
 0x6a3   : > { %v1678_v58 = vadd.f32 %v1674_v0, %v1670_v41 }
 0x6a4   : > { %v1653_v24 = vpop.trf.xlu0 }
 0x6a5   : > { %1682 = vst [vmem:[%s2710_s19 + $0x8] sm:$0xff] %v1678_v58  ;;  %v1671_v23 = vmul.f32 %v1668_v18, %v1653_v24 }
 0x6a7   : > { %v1679_v11 = vadd.f32 %v1675_v48, %v1671_v23 }
 0x6a8   : > { %v1654_v25 = vpop.trf.xlu0 }
 0x6a9   : > { %1683 = vst [vmem:[%s2710_s19 + $0x10] sm:$0xff] %v1679_v11  ;;  %v1672_v2 = vmul.f32 %v1668_v18, %v1654_v25 }
 0x6ab   : > { %v1680_v52 = vadd.f32 %v1676_v63, %v1672_v2 }
 0x6ad   : > { %1684 = vst [vmem:[%s2710_s19 + $0x18] sm:$0xff] %v1680_v52 }
 0x6ae PF: > { %s3295_s10 = sld [smem:[#allocation18_spill]]  ;;  %s1700_s7 = sshll.u32 %s2710_s19, 4  ;;  %s3161_s7 = int_to_ptr.vmem [resolvable:$true] %s1700_s7 }
 0x6af   : > { %s3296_s25 = sld [smem:[#allocation17_spill]]  ;;  %s1686_s5 = scalar_lea.sflag [#allocation9], %s2693_s18 }
 0x6b0   : > { %s3297_s21 = sld [smem:[#allocation21_spill]]  ;;  %s2288_s22 = scalar_lea.vmem %s3161_s7, 512 }
 0x6b1   : > { %s3298_s0 = sld [smem:[#allocation27_spill]]  ;;  %p2289_p9 = scmp.ne.s32.totalorder %s3161_s7, %s2288_s22 }
 0x6b2   : > { %s2443_s20 = smov [#allocation12]  }
 0x6b3   : > { %s2292_s9 = sshll.u32 %s2443_s20, 4  ;;  %s2293_s9 = int_to_ptr.vmem [resolvable:$false] %s2292_s9 }
 0x6b4   : > { %s1872_s23 = sshll.u32 %s3295_s10, 3  ;;  %s2294_s19 = scalar_lea.vmem %s2293_s9, 1024 }
 0x6b5   : > { %s1697_s12 = sadd.s32 %s3296_s25, %s1872_s23  ;;  %p2295_p12 = scmp.lt.s32.totalorder %s3161_s7, %s2293_s9 }
 0x6b6   : > { %s1873_s6 = sshll.u32 %s1697_s12, 7  ;;  %p3299_p2 = scmp.ne.s32.totalorder %s3297_s21, 0 }
 0x6b7   : > { %s3166_s17 = scalar_lea.hbm %s3298_s0, %s1873_s6  ;;  %p2296_p13 = scmp.lt.s32.totalorder %s2294_s19, %s2288_s22 }
 0x6b8   : > { %p2290_p1 = pnand %p2289_p9, %p3299_p2 }
 0x6b9   : > { %p2297_p11 = por %p2296_p13, %p2295_p12 }
 0x6ba   : > { %p2291_p5 = pneg %p2290_p1 }
 0x6bc   : > { %p2298_p0 = pnand %p2297_p11, %p2291_p5 }
 0x6be   : > { %2301 = shalt.err (!%p2298_p0)
}
 0x6bf   : > { %s2302_s10 = scalar_lea.hbm %s3166_s17, 512  ;;  %s2306_s12 = scalar_lea.hbm %s3298_s0, 2048 }
 0x6c0   : > { %p2303_p4 = scmp.ne.s32.totalorder %s3166_s17, %s2302_s10  ;;  %p2307_p3 = scmp.lt.s32.totalorder %s3166_s17, %s3298_s0 }
 0x6c1   : > { %p2308_p8 = scmp.lt.s32.totalorder %s2306_s12, %s2302_s10 }
 0x6c2   : > { %p2304_p10 = pnand %p2303_p4, %p3299_p2 }
 0x6c3   : > { %p2309_p7 = por %p2308_p8, %p2307_p3 }
 0x6c4   : > { %p2305_p6 = pneg %p2304_p10 }
 0x6c6   : > { %p2310_p9 = pnand %p2309_p7, %p2305_p6 }
 0x6c8   : > { %2313 = shalt.err (!%p2310_p9)
}
 0x6c9   : > { %s2444_s24 = smov 128   ;;  %s2445_s22 = smov 256  }
 0x6ca   : > { %s2446_s20 = smov 8  }
 0x6cb   : > { %1990 = dma.vmem_to_hbm [thread:$0]  (%p3299_p2), %s3161_s7, 512, %s3166_s17, %s1686_s5, %s2444_s24, %s2445_s22, %s2446_s20  }
 0x6cc PF: > { %s3300_s9 = sld [smem:[#allocation16_spill]]  ;;  %p2004_p1 = scmp.ge.s32.totalorder %s2428_s14, 2 }
 0x6cd   : > { %s3301_s19 = sld [smem:[#allocation22_spill]] }
 0x6d2   : > { %s1715_s25 = sand.u32 1, %s3300_s9  }
 0x6d3   : > { %p3302_p5 = scmp.ne.s32.totalorder %s3301_s19, 0  ;;  %s1716_s10 = scalar_lea.sflag [#allocation9], %s1715_s25 }
 0x6d5   : > { %p2000_p12 = pnand %p2004_p1, %p3302_p5 }
 0x6d7   : > { %p2001_p13 = pneg %p2000_p12 }
 0x6d9   : > { %2375 = dma.done.wait (%p2001_p13), %s1716_s10, 512  }
 0x6da   : > { %2377 = vsyncadd (%p2001_p13), %s1716_s10, 4294966784  ;;  %s27_s14 = sadd.s32 1, %s2428_s14   ;;  %s3304_s18 = smov %s2675_s29 }
 0x6db   : > { %p3196_p11 = scmp.ge.s32.totalorder %s27_s14, 10   ;;  %s3305_s9 = sld [smem:[#allocation19_spill]] }
 0x6dc   : > { %s3306_s6 = sld [smem:[#allocation20_spill]]  ;;  %s3309_s21 = smov %s3327_s26 }
 0x6dd   : > { %s3307_s11 = sld [smem:[#allocation23_spill]]  ;;  %s3310_s26 = smov %s2384_s27 }
 0x6de   : > { %s3308_s12 = sld [smem:[#allocation24_spill]]  ;;  %s3311_s27 = smov %s2388_s28 }
 0x6df   : > { %s3312_s28 = smov %s2680_s15  ;;  %s3313_s29 = smov %s2396_s30 }
 0x6e0   : > { %s3314_s30 = smov %s2400_s8  ;;  %s3315_s8 = smov %s3304_s18 }
 0x6e1   : > { %s3316_s10 = smov %s2424_s13  ;;  %s3317_s13 = smov %s3309_s21 }
 0x6e2   :  { %26 = sbr.rel (!%p3196_p11) target bundleno = 17 (0x11), region = 114 }
 0x6e7   :  { %1721 = vsyncpa [#allocation8], 1 }
 0x6e8   :  { %1723 = vsyncpa [#allocation8 + $0x1], 1 }
 0x6e9   :  { %1724 = vsyncpa [#allocation11], 1 }
 0x6ea   :  { %1726 = vsyncpa [#allocation11 + $0x1], 1 }
 0x6eb   :  { %1727 = vsyncpa [#allocation9], 1 }
 0x6ec   :  { %1729 = vsyncpa [#allocation9 + $0x1], 1 }

</bundles_post_ra>
